<compile_context>
chip_gen: v6e
topology: v6e:2x2x1
jax: 0.10.0
libtpu: 0.0.40
codegen_flags: <defaults>
</compile_context>

<pallas_src>
import functools

import jax
import jax.numpy as jnp
from jax import lax
from jax.experimental import pallas as pl
from jax.experimental.pallas import tpu as pltpu

_IN_FEATURES = 512
_H1 = 1024
_H2 = 512
_PADDED_CLASSES = 128  # lane-dense final layer (real classes sit in the first num_classes lanes)
_SHIFT_LEN = _H1 + _H2 + _PADDED_CLASSES  # 1664 = 13 * 128


def _fused_mlp_kernel(x_ref, w1_ref, w2_ref, w3_ref, shifts_ref, o_ref, *, num_classes):
    # x is bf16; all matmuls accumulate in f32 on the MXU, elementwise math stays f32.
    x = x_ref[...]

    # --- linear1 (BN scale folded into w1) + shift + relu; dropout = identity in eval ---
    h1 = jnp.dot(x, w1_ref[...], preferred_element_type=jnp.float32)
    h1 = jnp.maximum(h1 + shifts_ref[:, 0:_H1], 0.0)

    # --- linear2 ---
    h2 = jnp.dot(h1.astype(jnp.bfloat16), w2_ref[...], preferred_element_type=jnp.float32)
    h2 = jnp.maximum(h2 + shifts_ref[:, _H1:_H1 + _H2], 0.0)

    # --- linear3 (lane-padded to 128 output columns) ---
    h3 = jnp.dot(h2.astype(jnp.bfloat16), w3_ref[...], preferred_element_type=jnp.float32)
    h3 = jnp.maximum(h3 + shifts_ref[:, _H1 + _H2:_SHIFT_LEN], 0.0)

    # Mask padded lanes so they contribute exp(very negative) == 0 to the softmax sum.
    lane = lax.broadcasted_iota(jnp.int32, h3.shape, 1)
    h3 = jnp.where(lane < num_classes, h3, -1e30)

    # --- softmax over the class dimension (exact normalization so rows sum to 1) ---
    m = jnp.max(h3, axis=-1, keepdims=True)
    e = jnp.exp(h3 - m)
    denom = jnp.sum(e, axis=-1, keepdims=True)
    o_ref[...] = e / denom


def classifer_mnist_forward(x, prepared_params):
    """x: (B, C, H, W) with C*H*W == 512. Returns (B, num_classes) float32 probabilities."""
    w1, w2, w3p, shifts, num_classes = prepared_params
    B = x.shape[0]
    x2d = x.reshape(B, -1).astype(jnp.bfloat16)  # same flattening order as torch.flatten
    assert x2d.shape[1] == _IN_FEATURES

    # Batch tiling: single block for small B; 256-row tiles (weights stay resident) for large B.
    if B <= 256:
        tb = B
    else:
        assert B % 256 == 0, "pad batch to a multiple of 256 for the tiled path"
        tb = 256
    grid = (B // tb,)

    kernel = functools.partial(_fused_mlp_kernel, num_classes=num_classes)
    out_padded = pl.pallas_call(
        kernel,
        out_shape=jax.ShapeDtypeStruct((B, _PADDED_CLASSES), jnp.float32),
        grid=grid,
        in_specs=[
            pl.BlockSpec((tb, _IN_FEATURES), lambda i: (i, 0)),       # x: streamed over batch
            pl.BlockSpec((_IN_FEATURES, _H1), lambda i: (0, 0)),      # w1: resident
            pl.BlockSpec((_H1, _H2), lambda i: (0, 0)),               # w2: resident
            pl.BlockSpec((_H2, _PADDED_CLASSES), lambda i: (0, 0)),   # w3 (padded): resident
            pl.BlockSpec((1, _SHIFT_LEN), lambda i: (0, 0)),          # all shifts, one operand
        ],
        out_specs=pl.BlockSpec((tb, _PADDED_CLASSES), lambda i: (i, 0)),
        compiler_params=pltpu.CompilerParams(dimension_semantics=("parallel",)),
    )(x2d, w1, w2, w3p, shifts)

    return out_padded[:, :num_classes]


def make_raw_params(key, num_classes=10):
    """Mirrors the PyTorch module init: Linear w ~ N(0, 0.01), bias=0; BatchNorm1d defaults."""
    dims = [(_IN_FEATURES, _H1), (_H1, _H2), (_H2, num_classes)]
    keys = jax.random.split(key, len(dims))
    layers = []
    for k, (din, dout) in zip(keys, dims):
        w = jax.random.normal(k, (dout, din), jnp.float32) * 0.01  # PyTorch (out, in) layout
        b = jnp.zeros((dout,), jnp.float32)
        gamma = jnp.ones((dout,), jnp.float32)
        beta = jnp.zeros((dout,), jnp.float32)
        mean = jnp.zeros((dout,), jnp.float32)
        var = jnp.ones((dout,), jnp.float32)
        layers.append((w, b, gamma, beta, mean, var))
    return layers, num_classes


def fold_and_pack_params(raw_layers, num_classes):
    """One-time prep: fold eval-mode BN into weights/shift, cast weights to bf16,
    lane-pad the final layer to 128 columns, concatenate shifts into one vector."""
    eps = 1e-5
    folded_w, shift_vecs = [], []
    for (w, b, gamma, beta, mean, var) in raw_layers:
        scale = gamma / jnp.sqrt(var + eps)                       # (dout,)
        wf = (w.T * scale[None, :]).astype(jnp.bfloat16)          # (din, dout), BN scale folded
        shift = (beta + (b - mean) * scale).astype(jnp.float32)   # (dout,)
        folded_w.append(wf)
        shift_vecs.append(shift)

    pad = _PADDED_CLASSES - num_classes
    w3p = jnp.pad(folded_w[2], ((0, 0), (0, pad)))
    s3p = jnp.pad(shift_vecs[2], ((0, pad),))
    shifts = jnp.concatenate([shift_vecs[0], shift_vecs[1], s3p])[None, :]  # (1, 1664) f32
    return folded_w[0], folded_w[1], w3p, shifts, num_classes


def _reference_forward(x, prepared_params):
    """Pure-JAX reference using the same folded bf16 params as the kernel."""
    w1, w2, w3p, shifts, num_classes = prepared_params
    t1 = shifts[:, :_H1]
    t2 = shifts[:, _H1:_H1 + _H2]
    t3 = shifts[:, _H1 + _H2:_SHIFT_LEN]
    h = x.reshape(x.shape[0], -1).astype(jnp.bfloat16)
    h1 = jnp.maximum(jnp.dot(h, w1, preferred_element_type=jnp.float32) + t1, 0.0)
    h2 = jnp.maximum(jnp.dot(h1.astype(jnp.bfloat16), w2, preferred_element_type=jnp.float32) + t2, 0.0)
    h3 = jnp.maximum(jnp.dot(h2.astype(jnp.bfloat16), w3p, preferred_element_type=jnp.float32) + t3, 0.0)
    logits = h3[:, :num_classes]
    return jax.nn.softmax(logits, axis=-1)


if __name__ == "__main__":
    key = jax.random.PRNGKey(0)
    k_x, k_p = jax.random.split(key)

    # Small input: batch=8, NCHW = (8, 2, 16, 16) -> flattens to (8, 512).
    x = jax.random.normal(k_x, (8, 2, 16, 16), jnp.float32)
    raw_layers, num_classes = make_raw_params(k_p, num_classes=10)
    prepared = fold_and_pack_params(raw_layers, num_classes)

    out = classifer_mnist_forward(x, prepared)
    out = jax.block_until_ready(out)

    ref = _reference_forward(x, prepared)
    assert out.shape == (8, 10)
    assert jnp.allclose(out, ref, atol=2e-3, rtol=2e-3), float(jnp.max(jnp.abs(out - ref)))
    assert jnp.allclose(jnp.sum(out, axis=-1), 1.0, atol=1e-3)

    print("KERNEL_OK")
</pallas_src>

<mosaic_0001>
module attributes {stable_mosaic.version = 11 : i64} {
  func.func @_fused_mlp_kernel(%arg0: i32, %arg1: memref<8x512xbf16, #tpu.memory_space<vmem>>, %arg2: memref<512x1024xbf16, #tpu.memory_space<vmem>>, %arg3: memref<1024x512xbf16, #tpu.memory_space<vmem>>, %arg4: memref<512x128xbf16, #tpu.memory_space<vmem>>, %arg5: memref<1x1664xf32, #tpu.memory_space<vmem>>, %arg6: memref<8x128xf32, #tpu.memory_space<vmem>>) attributes {dimension_semantics = [#tpu.dimension_semantics<parallel>], iteration_bounds = array<i64: 1>, scalar_prefetch = 0 : i64, scratch_operands = 0 : i64, tpu.core_type = #tpu.core_type<tc>, window_params = [{transform_indices = @transform_0, window_bounds = array<i64: 8, 512>}, {pipeline_mode = #tpu.pipeline_mode<synchronous>, transform_indices = @transform_1, window_bounds = array<i64: 512, 1024>}, {pipeline_mode = #tpu.pipeline_mode<synchronous>, transform_indices = @transform_2, window_bounds = array<i64: 1024, 512>}, {pipeline_mode = #tpu.pipeline_mode<synchronous>, transform_indices = @transform_3, window_bounds = array<i64: 512, 128>}, {pipeline_mode = #tpu.pipeline_mode<synchronous>, transform_indices = @transform_4, window_bounds = array<i64: 1, 1664>}, {transform_indices = @transform_5, window_bounds = array<i64: 8, 128>}]} {
    %c0 = arith.constant 0 : index
    %c0_0 = arith.constant 0 : index
    %0 = vector.load %arg1[%c0, %c0_0] : memref<8x512xbf16, #tpu.memory_space<vmem>>, vector<8x512xbf16>
    %c0_1 = arith.constant 0 : index
    %c0_2 = arith.constant 0 : index
    %1 = vector.load %arg2[%c0_1, %c0_2] : memref<512x1024xbf16, #tpu.memory_space<vmem>>, vector<512x1024xbf16>
    %cst = arith.constant dense<0.000000e+00> : vector<8x1024xf32>
    %2 = tpu.matmul %0, %1, %cst {dimension_numbers = #tpu.dot_dimension_numbers<[1], [0], [0], [1], [0, 0, 1, 1], [], []>} : vector<8x512xbf16>, vector<512x1024xbf16>, vector<8x1024xf32> -> vector<8x1024xf32>
    %c0_3 = arith.constant 0 : index
    %c0_4 = arith.constant 0 : index
    %3 = vector.load %arg5[%c0_3, %c0_4] : memref<1x1664xf32, #tpu.memory_space<vmem>>, vector<1x1024xf32>
    %4 = vector.broadcast %3 : vector<1x1024xf32> to vector<8x1024xf32>
    %5 = arith.addf %2, %4 : vector<8x1024xf32>
    %cst_5 = arith.constant 0.000000e+00 : f32
    %6 = vector.broadcast %cst_5 : f32 to vector<8x1024xf32>
    %7 = arith.maximumf %5, %6 : vector<8x1024xf32>
    %8 = arith.truncf %7 : vector<8x1024xf32> to vector<8x1024xbf16>
    %c0_6 = arith.constant 0 : index
    %c0_7 = arith.constant 0 : index
    %9 = vector.load %arg3[%c0_6, %c0_7] : memref<1024x512xbf16, #tpu.memory_space<vmem>>, vector<1024x512xbf16>
    %cst_8 = arith.constant dense<0.000000e+00> : vector<8x512xf32>
    %10 = tpu.matmul %8, %9, %cst_8 {dimension_numbers = #tpu.dot_dimension_numbers<[1], [0], [0], [1], [0, 0, 1, 1], [], []>} : vector<8x1024xbf16>, vector<1024x512xbf16>, vector<8x512xf32> -> vector<8x512xf32>
    %c0_9 = arith.constant 0 : index
    %c1024 = arith.constant 1024 : index
    %11 = vector.load %arg5[%c0_9, %c1024] : memref<1x1664xf32, #tpu.memory_space<vmem>>, vector<1x512xf32>
    %12 = vector.broadcast %11 : vector<1x512xf32> to vector<8x512xf32>
    %13 = arith.addf %10, %12 : vector<8x512xf32>
    %cst_10 = arith.constant 0.000000e+00 : f32
    %14 = vector.broadcast %cst_10 : f32 to vector<8x512xf32>
    %15 = arith.maximumf %13, %14 : vector<8x512xf32>
    %16 = arith.truncf %15 : vector<8x512xf32> to vector<8x512xbf16>
    %c0_11 = arith.constant 0 : index
    %c0_12 = arith.constant 0 : index
    %17 = vector.load %arg4[%c0_11, %c0_12] : memref<512x128xbf16, #tpu.memory_space<vmem>>, vector<512x128xbf16>
    %cst_13 = arith.constant dense<0.000000e+00> : vector<8x128xf32>
    %18 = tpu.matmul %16, %17, %cst_13 {dimension_numbers = #tpu.dot_dimension_numbers<[1], [0], [0], [1], [0, 0, 1, 1], [], []>} : vector<8x512xbf16>, vector<512x128xbf16>, vector<8x128xf32> -> vector<8x128xf32>
    %c0_14 = arith.constant 0 : index
    %c1536 = arith.constant 1536 : index
    %19 = vector.load %arg5[%c0_14, %c1536] : memref<1x1664xf32, #tpu.memory_space<vmem>>, vector<1x128xf32>
    %20 = vector.broadcast %19 : vector<1x128xf32> to vector<8x128xf32>
    %21 = arith.addf %18, %20 : vector<8x128xf32>
    %cst_15 = arith.constant 0.000000e+00 : f32
    %22 = vector.broadcast %cst_15 : f32 to vector<8x128xf32>
    %23 = arith.maximumf %21, %22 : vector<8x128xf32>
    %24 = tpu.iota {dimensions = array<i32: 1>} : vector<8x128xi32>
    %c10_i32 = arith.constant 10 : i32
    %25 = vector.broadcast %c10_i32 : i32 to vector<8x128xi32>
    %26 = arith.cmpi slt, %24, %25 : vector<8x128xi32>
    %cst_16 = arith.constant -1.000000e+30 : f32
    %27 = vector.broadcast %cst_16 : f32 to vector<8x128xf32>
    %28 = arith.select %26, %23, %27 : vector<8x128xi1>, vector<8x128xf32>
    %cst_17 = arith.constant dense<0xFF800000> : vector<8xf32>
    %29 = vector.multi_reduction <maximumf>, %28, %cst_17 [1] : vector<8x128xf32> to vector<8xf32>
    %30 = vector.shape_cast %29 : vector<8xf32> to vector<8x1xf32>
    %31 = vector.broadcast %30 : vector<8x1xf32> to vector<8x128xf32>
    %32 = arith.subf %28, %31 : vector<8x128xf32>
    %33 = math.exp %32 : vector<8x128xf32>
    %cst_18 = arith.constant dense<0.000000e+00> : vector<8xf32>
    %34 = vector.multi_reduction <add>, %33, %cst_18 [1] : vector<8x128xf32> to vector<8xf32>
    %35 = vector.shape_cast %34 : vector<8xf32> to vector<8x1xf32>
    %36 = vector.broadcast %35 : vector<8x1xf32> to vector<8x128xf32>
    %37 = arith.divf %33, %36 : vector<8x128xf32>
    %c0_19 = arith.constant 0 : index
    %c0_20 = arith.constant 0 : index
    %38 = vector.load %arg6[%c0_19, %c0_20] : memref<8x128xf32, #tpu.memory_space<vmem>>, vector<8x128xf32>
    tpu.vector_store %arg6[%c0_19, %c0_20], %37 {strides = array<i32>} : memref<8x128xf32, #tpu.memory_space<vmem>>, vector<8x128xf32>,
    return
  }
  func.func @transform_0(%arg0: i32) -> (i32, i32) {
    %c0_i32 = arith.constant 0 : i32
    %c0_i32_0 = arith.constant 0 : i32
    return %arg0, %c0_i32 : i32, i32
  }
  func.func @transform_1(%arg0: i32) -> (i32, i32) {
    %c0_i32 = arith.constant 0 : i32
    %c0_i32_0 = arith.constant 0 : i32
    %c0_i32_1 = arith.constant 0 : i32
    return %c0_i32, %c0_i32_0 : i32, i32
  }
  func.func @transform_2(%arg0: i32) -> (i32, i32) {
    %c0_i32 = arith.constant 0 : i32
    %c0_i32_0 = arith.constant 0 : i32
    %c0_i32_1 = arith.constant 0 : i32
    return %c0_i32, %c0_i32_0 : i32, i32
  }
  func.func @transform_3(%arg0: i32) -> (i32, i32) {
    %c0_i32 = arith.constant 0 : i32
    %c0_i32_0 = arith.constant 0 : i32
    %c0_i32_1 = arith.constant 0 : i32
    return %c0_i32, %c0_i32_0 : i32, i32
  }
  func.func @transform_4(%arg0: i32) -> (i32, i32) {
    %c0_i32 = arith.constant 0 : i32
    %c0_i32_0 = arith.constant 0 : i32
    %c0_i32_1 = arith.constant 0 : i32
    return %c0_i32, %c0_i32_0 : i32, i32
  }
  func.func @transform_5(%arg0: i32) -> (i32, i32) {
    %c0_i32 = arith.constant 0 : i32
    %c0_i32_0 = arith.constant 0 : i32
    return %arg0, %c0_i32 : i32, i32
  }
}

</mosaic_0001>

<bundles_post_ra>
// kernel: tpu_custom_call.1
= control target key start
LH: loop header
LB: loop body
LE: loop exit
PB: predicated region body
PF: predicated region fallthrough
CT: control target
= control target key end

     0   :  { %10 = vsyncpa [#allocation3], 0  ;;  %s5634_s0 = inlined_call_operand.hbm [shape: bf16[8,512], index: 0, kind: input, shape index: {}]   ;;  %s5635_s1 = inlined_call_operand.hbm [shape: bf16[512,1024], index: 1, kind: input, shape index: {}]   ;;  %s5636_s2 = inlined_call_operand.hbm [shape: bf16[1024,512], index: 2, kind: input, shape index: {}]   ;;  %s5637_s3 = inlined_call_operand.hbm [shape: bf16[512,128], index: 3, kind: input, shape index: {}]   ;;  %s5638_s4 = inlined_call_operand.hbm [shape: f32[1,1664], index: 4, kind: input, shape index: {}]   ;;  %s5639_s5 = inlined_call_operand.hbm [shape: f32[8,128], index: 5, kind: output, shape index: {}]  }
   0x1   :  { %11 = vsyncpa [#allocation6], 0 }
   0x2   :  { %12 = vsyncpa [#allocation9], 0 }
   0x3   :  { %13 = vsyncpa [#allocation4], 0  ;;  %s5450_s18 = smov [#allocation5]  }
   0x4   :  { %s29_s19 = sshll.u32 %s5450_s18, 4  ;;  %s30_s19 = int_to_ptr.vmem [resolvable:$true] %s29_s19 }
   0x5   :  { %s5330_s20 = scalar_lea.vmem %s30_s19, 32768  ;;  %p5335_p1 = scmp.lt.s32.totalorder %s30_s19, %s30_s19 }
   0x6   :  { %p5331_p0 = scmp.ne.s32.totalorder %s30_s19, %s5330_s20  ;;  %p5336_p2 = scmp.lt.s32.totalorder %s5330_s20, %s5330_s20 }
   0x8   :  { %p5337_p3 = por %p5336_p2, %p5335_p1 }
   0xa   :  { %p5338_p4 = pnand %p5337_p3, %p5331_p0 }
   0xc   :  { %5341 = shalt.err (!%p5338_p4)
}
   0xd   :  { %s5451_s21 = smov 512   ;;  %s5452_s22 = smov 32  }
   0xe   :  { %35 = dma.hbm_to_vmem [thread:$0]  %s5635_s1, 32768, %s30_s19, [#allocation6], %s5451_s21, %s5451_s21, %s5452_s22  }
   0xf   :  { %s5453_s25 = smov [#allocation8]  }
  0x10   :  { %s53_s26 = sshll.u32 %s5453_s25, 4  ;;  %s54_s26 = int_to_ptr.vmem [resolvable:$true] %s53_s26 }
  0x11   :  { %s5350_s27 = scalar_lea.vmem %s54_s26, 4096  ;;  %p5355_p6 = scmp.lt.s32.totalorder %s54_s26, %s54_s26 }
  0x12   :  { %p5351_p5 = scmp.ne.s32.totalorder %s54_s26, %s5350_s27  ;;  %p5356_p7 = scmp.lt.s32.totalorder %s5350_s27, %s5350_s27 }
  0x14   :  { %p5357_p8 = por %p5356_p7, %p5355_p6 }
  0x16   :  { %p5358_p9 = pnand %p5357_p8, %p5351_p5 }
  0x18   :  { %5361 = shalt.err (!%p5358_p9)
}
  0x19   :  { %s5454_s28 = smov 64   ;;  %s5455_s29 = smov 4  }
  0x1a   :  { %59 = dma.hbm_to_vmem [thread:$0]  %s5637_s3, 4096, %s54_s26, [#allocation9], %s5454_s28, %s5454_s28, %s5455_s29  }
  0x1b   :  { %s5456_s7 = smov [#allocation2]   ;;  %s5457_s9 = smov [#allocation7]  }
  0x1c   :  { %s20_s8 = sshll.u32 %s5456_s7, 4  ;;  %s41_s1 = sshll.u32 %s5457_s9, 4  ;;  %s21_s8 = int_to_ptr.vmem [resolvable:$true] %s20_s8  ;;  %s42_s1 = int_to_ptr.vmem [resolvable:$true] %s41_s1 }
  0x1d   :  { %s5370_s10 = scalar_lea.vmem %s21_s8, 256  ;;  %p5375_p11 = scmp.lt.s32.totalorder %s21_s8, %s21_s8 }
  0x1e   :  { %p5371_p10 = scmp.ne.s32.totalorder %s21_s8, %s5370_s10  ;;  %p5376_p12 = scmp.lt.s32.totalorder %s5370_s10, %s5370_s10 }
  0x20   :  { %p5377_p13 = por %p5376_p12, %p5375_p11 }
  0x22   :  { %p5378_p0 = pnand %p5377_p13, %p5371_p10 }
  0x24   :  { %5381 = shalt.err (!%p5378_p0)
}
  0x25   :  { %23 = dma.hbm_to_vmem [thread:$0]  %s5634_s0, 256, %s21_s8, [#allocation3]  }
  0x26   :  { %s5390_s13 = scalar_lea.vmem %s42_s1, 32768  ;;  %p5395_p2 = scmp.lt.s32.totalorder %s42_s1, %s42_s1 }
  0x27   :  { %p5391_p1 = scmp.ne.s32.totalorder %s42_s1, %s5390_s13  ;;  %p5396_p3 = scmp.lt.s32.totalorder %s5390_s13, %s5390_s13 }
  0x29   :  { %p5397_p4 = por %p5396_p3, %p5395_p2 }
  0x2b   :  { %p5398_p5 = pnand %p5397_p4, %p5391_p1 }
  0x2d   :  { %5401 = shalt.err (!%p5398_p5)
}
  0x2e   :  { %s5458_s3 = smov 256   ;;  %s5459_s14 = smov 16  }
  0x2f   :  { %47 = dma.hbm_to_vmem [thread:$0]  %s5636_s2, 32768, %s42_s1, [#allocation6], %s5458_s3, %s5458_s3, %s5459_s14  }
  0x30   :  { %s5460_s17 = smov [#allocation10]  }
  0x31   :  { %s66_s18 = sshll.u32 %s5460_s17, 4  ;;  %s67_s18 = int_to_ptr.vmem [resolvable:$true] %s66_s18 }
  0x32   :  { %s5410_s19 = scalar_lea.vmem %s67_s18, 208  ;;  %s5414_s20 = scalar_lea.vmem %s67_s18, 224 }
  0x33   :  { %p5411_p6 = scmp.ne.s32.totalorder %s67_s18, %s5410_s19  ;;  %p5415_p7 = scmp.lt.s32.totalorder %s67_s18, %s67_s18 }
  0x34   :  { %p5416_p8 = scmp.lt.s32.totalorder %s5414_s20, %s5410_s19 }
  0x36   :  { %p5417_p9 = por %p5416_p8, %p5415_p7 }
  0x38   :  { %p5418_p10 = pnand %p5417_p9, %p5411_p6 }
  0x3a   :  { %5421 = shalt.err (!%p5418_p10)
}
  0x3b   :  { %69 = dma.hbm_to_vmem [thread:$0]  %s5638_s4, 208, %s67_s18, [#allocation9]  }
  0x3c   :  { %5442 = dma.done.wait [#allocation3], 256  }
  0x3d   :  { %5443 = vsyncadd [#allocation3], 4294967040 }
  0x3e   :  { %5444 = dma.done.wait [#allocation6], 65536  }
  0x3f   :  { %5445 = vsyncadd [#allocation6], 4294901760 }
  0x40   :  { %5446 = dma.done.wait [#allocation9], 4304  }
  0x41   :  { %5447 = vsyncadd [#allocation9], 4294962992  ;;  %v144_v0 = vld [vmem:[#allocation5 + $0x1c0] sm:$0xff]  ;;  %v5507_v53 = vld [vmem:[#allocation2] sm:$0xff]  ;;  %s5461_s2 = smov [#allocation11]  }
  0x42   :  { %v148_v1 = vld [vmem:[#allocation5 + $0x1e0] sm:$0xff]  ;;  %v5509_v54 = vld [vmem:[#allocation2 + $0x8] sm:$0xff]  ;;  %v5513_v58 = vcombine.high %v5507_v53, %v5507_v53  ;;  %s4282_s4 = sshll.u32 %s5461_s2, 4  ;;  %s4283_s4 = int_to_ptr.vmem [resolvable:$true] %s4282_s4 }
  0x43   :  { %v272_v2 = vld [vmem:[#allocation5 + $0x5c0] sm:$0xff]  ;;  %v4354_v3 = vcombine.high %v144_v0, %v148_v1  ;;  %v4353_v5 = vcombine.low %v144_v0, %v148_v1  ;;  %v5517_v59 = vcombine.high %v5509_v54, %v5509_v54  ;;  %s5422_s22 = scalar_lea.vmem %s4283_s4, 128  ;;  %p5427_p12 = scmp.lt.s32.totalorder %s4283_s4, %s4283_s4 }
  0x44   :  { %v276_v4 = vld [vmem:[#allocation5 + $0x5e0] sm:$0xff]  ;;  %1712 = vmatprep.mubr.bf16.mxu0 %v5513_v58  ;;  %p5423_p11 = scmp.ne.s32.totalorder %s4283_s4, %s5422_s22  ;;  %p5428_p13 = scmp.lt.s32.totalorder %s5422_s22, %s5422_s22 }
  0x45   :  { %v136_v6 = vld [vmem:[#allocation5 + $0x180] sm:$0xff]  ;;  %v4482_v8 = vcombine.high %v272_v2, %v276_v4  ;;  %v4481_v9 = vcombine.low %v272_v2, %v276_v4  ;;  %1680 = vmatprep.subr.bf16.mxu0 %v4354_v3  ;;  %1753 = vmatprep.mubr.bf16.mxu1 %v5517_v59 }
  0x46   :  { %v140_v7 = vld [vmem:[#allocation5 + $0x1a0] sm:$0xff]  ;;  %1681 = vmatpush1.bf16.msra.mxu0 %v4353_v5  ;;  %p5429_p0 = por %p5428_p13, %p5427_p12 }
  0x47   :  { %v4346_v10 = vcombine.high %v136_v6, %v140_v7  ;;  %v264_v11 = vld [vmem:[#allocation5 + $0x580] sm:$0xff]  ;;  %1721 = vmatprep.subr.bf16.mxu1 %v4482_v8  ;;  %v4345_v18 = vcombine.low %v136_v6, %v140_v7 }
  0x48   :  { %v268_v12 = vld [vmem:[#allocation5 + $0x5a0] sm:$0xff]  ;;  %1722 = vmatpush1.bf16.msra.mxu1 %v4481_v9  ;;  %p5430_p1 = pnand %p5429_p0, %p5423_p11 }
  0x49   :  { %v128_v13 = vld [vmem:[#allocation5 + $0x140] sm:$0xff]  ;;  %v4474_v14 = vcombine.high %v264_v11, %v268_v12  ;;  %1682 = vmatprep.subr.bf16.mxu0 %v4346_v10  ;;  %v4473_v19 = vcombine.low %v264_v11, %v268_v12 }
  0x4a   :  { %v132_v15 = vld [vmem:[#allocation5 + $0x160] sm:$0xff]  ;;  %1683 = vmatpush1.bf16.msra.mxu0 %v4345_v18 }
  0x4b   :  { %v256_v16 = vld [vmem:[#allocation5 + $0x540] sm:$0xff]  ;;  %v4338_v20 = vcombine.high %v128_v13, %v132_v15  ;;  %1723 = vmatprep.subr.bf16.mxu1 %v4474_v14  ;;  %v4337_v26 = vcombine.low %v128_v13, %v132_v15 }
  0x4c   :  { %v260_v17 = vld [vmem:[#allocation5 + $0x560] sm:$0xff]  ;;  %1724 = vmatpush1.bf16.msra.mxu1 %v4473_v19 }
  0x4d   :  { %v4466_v21 = vcombine.high %v256_v16, %v260_v17  ;;  %v120_v22 = vld [vmem:[#allocation5 + $0x100] sm:$0xff]  ;;  %1684 = vmatprep.subr.bf16.mxu0 %v4338_v20  ;;  %v4465_v27 = vcombine.low %v256_v16, %v260_v17 }
  0x4e   :  { %v124_v23 = vld [vmem:[#allocation5 + $0x120] sm:$0xff]  ;;  %1685 = vmatpush1.bf16.msra.mxu0 %v4337_v26 }
  0x4f   :  { %v248_v24 = vld [vmem:[#allocation5 + $0x500] sm:$0xff]  ;;  %v4330_v28 = vcombine.high %v120_v22, %v124_v23  ;;  %1725 = vmatprep.subr.bf16.mxu1 %v4466_v21  ;;  %v4329_v34 = vcombine.low %v120_v22, %v124_v23 }
  0x50   :  { %v252_v25 = vld [vmem:[#allocation5 + $0x520] sm:$0xff]  ;;  %1726 = vmatpush1.bf16.msra.mxu1 %v4465_v27 }
  0x51   :  { %v4458_v29 = vcombine.high %v248_v24, %v252_v25  ;;  %v112_v30 = vld [vmem:[#allocation5 + $0xc0] sm:$0xff]  ;;  %1686 = vmatprep.subr.bf16.mxu0 %v4330_v28  ;;  %v4457_v35 = vcombine.low %v248_v24, %v252_v25 }
  0x52   :  { %v116_v31 = vld [vmem:[#allocation5 + $0xe0] sm:$0xff]  ;;  %1687 = vmatpush1.bf16.msra.mxu0 %v4329_v34 }
  0x53   :  { %v240_v32 = vld [vmem:[#allocation5 + $0x4c0] sm:$0xff]  ;;  %v4322_v36 = vcombine.high %v112_v30, %v116_v31  ;;  %1727 = vmatprep.subr.bf16.mxu1 %v4458_v29  ;;  %v4321_v42 = vcombine.low %v112_v30, %v116_v31 }
  0x54   :  { %v244_v33 = vld [vmem:[#allocation5 + $0x4e0] sm:$0xff]  ;;  %1728 = vmatpush1.bf16.msra.mxu1 %v4457_v35 }
  0x55   :  { %v4450_v37 = vcombine.high %v240_v32, %v244_v33  ;;  %v104_v38 = vld [vmem:[#allocation5 + $0x80] sm:$0xff]  ;;  %1688 = vmatprep.subr.bf16.mxu0 %v4322_v36  ;;  %v4449_v43 = vcombine.low %v240_v32, %v244_v33 }
  0x56   :  { %v108_v39 = vld [vmem:[#allocation5 + $0xa0] sm:$0xff]  ;;  %1689 = vmatpush1.bf16.msra.mxu0 %v4321_v42 }
  0x57   :  { %v232_v40 = vld [vmem:[#allocation5 + $0x480] sm:$0xff]  ;;  %v4314_v44 = vcombine.high %v104_v38, %v108_v39  ;;  %1729 = vmatprep.subr.bf16.mxu1 %v4450_v37  ;;  %v4313_v50 = vcombine.low %v104_v38, %v108_v39 }
  0x58   :  { %v236_v41 = vld [vmem:[#allocation5 + $0x4a0] sm:$0xff]  ;;  %1730 = vmatpush1.bf16.msra.mxu1 %v4449_v43 }
  0x59   :  { %v4442_v45 = vcombine.high %v232_v40, %v236_v41  ;;  %v96_v46 = vld [vmem:[#allocation5 + $0x40] sm:$0xff]  ;;  %1690 = vmatprep.subr.bf16.mxu0 %v4314_v44  ;;  %v4441_v51 = vcombine.low %v232_v40, %v236_v41 }
  0x5a   :  { %v100_v47 = vld [vmem:[#allocation5 + $0x60] sm:$0xff]  ;;  %1691 = vmatpush1.bf16.msra.mxu0 %v4313_v50 }
  0x5b   :  { %v224_v48 = vld [vmem:[#allocation5 + $0x440] sm:$0xff]  ;;  %v4306_v52 = vcombine.high %v96_v46, %v100_v47  ;;  %1731 = vmatprep.subr.bf16.mxu1 %v4442_v45  ;;  %v4305_v62 = vcombine.low %v96_v46, %v100_v47 }
  0x5c   :  { %v228_v49 = vld [vmem:[#allocation5 + $0x460] sm:$0xff]  ;;  %1732 = vmatpush1.bf16.msra.mxu1 %v4441_v51 }
  0x5d   :  { %v4434_v55 = vcombine.high %v224_v48, %v228_v49  ;;  %v88_v56 = vld [vmem:[#allocation5] sm:$0xff]  ;;  %1692 = vmatprep.subr.bf16.mxu0 %v4306_v52  ;;  %v4433_v63 = vcombine.low %v224_v48, %v228_v49 }
  0x5e   :  { %v92_v57 = vld [vmem:[#allocation5 + $0x20] sm:$0xff]  ;;  %1693 = vmatpush1.bf16.msra.mxu0 %v4305_v62 }
  0x5f   :  { %v216_v60 = vld [vmem:[#allocation5 + $0x400] sm:$0xff]  ;;  %v4298_v0 = vcombine.high %v88_v56, %v92_v57  ;;  %1733 = vmatprep.subr.bf16.mxu1 %v4434_v55  ;;  %v4297_v6 = vcombine.low %v88_v56, %v92_v57 }
  0x60   :  { %v220_v61 = vld [vmem:[#allocation5 + $0x420] sm:$0xff]  ;;  %1734 = vmatpush1.bf16.msra.mxu1 %v4433_v63 }
  0x61   :  { %v4426_v1 = vcombine.high %v216_v60, %v220_v61  ;;  %v208_v2 = vld [vmem:[#allocation5 + $0x3c0] sm:$0xff]  ;;  %1694 = vmatprep.subr.bf16.mxu0 %v4298_v0  ;;  %v4425_v7 = vcombine.low %v216_v60, %v220_v61 }
  0x62   :  { %v212_v3 = vld [vmem:[#allocation5 + $0x3e0] sm:$0xff]  ;;  %1695 = vmatpush1.bf16.msra.mxu0 %v4297_v6  ;;  %v145_v6 = vld [vmem:[#allocation5 + $0x1c8] sm:$0xff] }
  0x63   :  { %v336_v4 = vld [vmem:[#allocation5 + $0x7c0] sm:$0xff]  ;;  %v4418_v8 = vcombine.high %v208_v2, %v212_v3  ;;  %1735 = vmatprep.subr.bf16.mxu1 %v4426_v1  ;;  %v4417_v14 = vcombine.low %v208_v2, %v212_v3 }
  0x64   :  { %v340_v5 = vld [vmem:[#allocation5 + $0x7e0] sm:$0xff]  ;;  %1736 = vmatpush1.bf16.msra.mxu1 %v4425_v7  ;;  %v149_v7 = vld [vmem:[#allocation5 + $0x1e8] sm:$0xff] }
  0x65   :  { %v4546_v9 = vcombine.high %v336_v4, %v340_v5  ;;  %v200_v10 = vld [vmem:[#allocation5 + $0x380] sm:$0xff]  ;;  %1696 = vmatprep.subr.bf16.mxu0 %v4418_v8  ;;  %v4545_v15 = vcombine.low %v336_v4, %v340_v5  ;;  %v273_v8 = vld [vmem:[#allocation5 + $0x5c8] sm:$0xff] }
  0x66   :  { %v204_v11 = vld [vmem:[#allocation5 + $0x3a0] sm:$0xff]  ;;  %1697 = vmatpush2.bf16.msra.mxu0 %v4417_v14  ;;  %v137_v14 = vld [vmem:[#allocation5 + $0x188] sm:$0xff] }
  0x67   :  { %v328_v12 = vld [vmem:[#allocation5 + $0x780] sm:$0xff]  ;;  %v4410_v16 = vcombine.high %v200_v10, %v204_v11  ;;  %1737 = vmatprep.subr.bf16.mxu1 %v4546_v9  ;;  %v4409_v22 = vcombine.low %v200_v10, %v204_v11  ;;  %v277_v9 = vld [vmem:[#allocation5 + $0x5e8] sm:$0xff] }
  0x68   :  { %v332_v13 = vld [vmem:[#allocation5 + $0x7a0] sm:$0xff]  ;;  %1738 = vmatpush2.bf16.msra.mxu1 %v4545_v15  ;;  %v141_v15 = vld [vmem:[#allocation5 + $0x1a8] sm:$0xff] }
  0x69   :  { %v4538_v17 = vcombine.high %v328_v12, %v332_v13  ;;  %v192_v18 = vld [vmem:[#allocation5 + $0x340] sm:$0xff]  ;;  %1698 = vmatprep.subr.bf16.mxu0 %v4410_v16  ;;  %v4537_v23 = vcombine.low %v328_v12, %v332_v13  ;;  %v4356_v12 = vcombine.high %v145_v6, %v149_v7  ;;  %v4484_v13 = vcombine.high %v273_v8, %v277_v9 }
  0x6a   :  { %v196_v19 = vld [vmem:[#allocation5 + $0x360] sm:$0xff]  ;;  %1699 = vmatpush2.bf16.msra.mxu0 %v4409_v22  ;;  %v5523_v16 = vcombine.low %v5507_v53, %v5507_v53  ;;  %v4348_v22 = vcombine.high %v137_v14, %v141_v15  ;;  %v4347_v53 = vcombine.low %v137_v14, %v141_v15 }
  0x6b   :  { %v320_v20 = vld [vmem:[#allocation5 + $0x740] sm:$0xff]  ;;  %v4402_v24 = vcombine.high %v192_v18, %v196_v19  ;;  %1739 = vmatprep.subr.bf16.mxu1 %v4538_v17  ;;  %v4401_v30 = vcombine.low %v192_v18, %v196_v19  ;;  %v265_v17 = vld [vmem:[#allocation5 + $0x588] sm:$0xff]  ;;  %v5527_v19 = vcombine.low %v5509_v54, %v5509_v54 }
  0x6c   :  { %v324_v21 = vld [vmem:[#allocation5 + $0x760] sm:$0xff]  ;;  %1740 = vmatpush2.bf16.msra.mxu1 %v4537_v23  ;;  %v269_v18 = vld [vmem:[#allocation5 + $0x5a8] sm:$0xff] }
  0x6d   :  { %v4530_v25 = vcombine.high %v320_v20, %v324_v21  ;;  %v184_v26 = vld [vmem:[#allocation5 + $0x300] sm:$0xff]  ;;  %1700 = vmatprep.subr.bf16.mxu0 %v4402_v24  ;;  %v4529_v31 = vcombine.low %v320_v20, %v324_v21  ;;  %v4355_v20 = vcombine.low %v145_v6, %v149_v7  ;;  %v4483_v21 = vcombine.low %v273_v8, %v277_v9  ;;  %v129_v23 = vld [vmem:[#allocation5 + $0x148] sm:$0xff] }
  0x6e   :  { %v188_v27 = vld [vmem:[#allocation5 + $0x320] sm:$0xff]  ;;  %1701 = vmatpush2.bf16.msra.mxu0 %v4401_v30  ;;  %v133_v24 = vld [vmem:[#allocation5 + $0x168] sm:$0xff]  ;;  %v4475_v54 = vcombine.low %v265_v17, %v269_v18 }
  0x6f   :  { %v312_v28 = vld [vmem:[#allocation5 + $0x700] sm:$0xff]  ;;  %v4394_v32 = vcombine.high %v184_v26, %v188_v27  ;;  %1741 = vmatprep.subr.bf16.mxu1 %v4530_v25  ;;  %v4393_v38 = vcombine.low %v184_v26, %v188_v27  ;;  %v257_v25 = vld [vmem:[#allocation5 + $0x548] sm:$0xff]  ;;  %v4476_v26 = vcombine.high %v265_v17, %v269_v18 }
  0x70   :  { %v316_v29 = vld [vmem:[#allocation5 + $0x720] sm:$0xff]  ;;  %1742 = vmatpush2.bf16.msra.mxu1 %v4529_v31  ;;  %v261_v27 = vld [vmem:[#allocation5 + $0x568] sm:$0xff] }
  0x71   :  { %v4522_v33 = vcombine.high %v312_v28, %v316_v29  ;;  %v176_v34 = vld [vmem:[#allocation5 + $0x2c0] sm:$0xff]  ;;  %1702 = vmatprep.subr.bf16.mxu0 %v4394_v32  ;;  %v4521_v39 = vcombine.low %v312_v28, %v316_v29  ;;  %v4340_v28 = vcombine.high %v129_v23, %v133_v24  ;;  %v121_v29 = vld [vmem:[#allocation5 + $0x108] sm:$0xff]  ;;  %v4468_v32 = vcombine.high %v257_v25, %v261_v27 }
  0x72   :  { %v180_v35 = vld [vmem:[#allocation5 + $0x2e0] sm:$0xff]  ;;  %1703 = vmatpush2.bf16.msra.mxu0 %v4393_v38  ;;  %v125_v30 = vld [vmem:[#allocation5 + $0x128] sm:$0xff] }
  0x73   :  { %v304_v36 = vld [vmem:[#allocation5 + $0x6c0] sm:$0xff]  ;;  %v4386_v40 = vcombine.high %v176_v34, %v180_v35  ;;  %1743 = vmatprep.subr.bf16.mxu1 %v4522_v33  ;;  %v4385_v46 = vcombine.low %v176_v34, %v180_v35  ;;  %v249_v31 = vld [vmem:[#allocation5 + $0x508] sm:$0xff]  ;;  %v4339_v34 = vcombine.low %v129_v23, %v133_v24  ;;  %v4467_v35 = vcombine.low %v257_v25, %v261_v27 }
  0x74   :  { %v308_v37 = vld [vmem:[#allocation5 + $0x6e0] sm:$0xff]  ;;  %1744 = vmatpush2.bf16.msra.mxu1 %v4521_v39  ;;  %v253_v33 = vld [vmem:[#allocation5 + $0x528] sm:$0xff] }
  0x75   :  { %v4514_v41 = vcombine.high %v304_v36, %v308_v37  ;;  %v168_v42 = vld [vmem:[#allocation5 + $0x280] sm:$0xff]  ;;  %1704 = vmatprep.subr.bf16.mxu0 %v4386_v40  ;;  %v4513_v47 = vcombine.low %v304_v36, %v308_v37  ;;  %v4332_v36 = vcombine.high %v121_v29, %v125_v30  ;;  %v113_v37 = vld [vmem:[#allocation5 + $0xc8] sm:$0xff]  ;;  %v4460_v40 = vcombine.high %v249_v31, %v253_v33 }
  0x76   :  { %v172_v43 = vld [vmem:[#allocation5 + $0x2a0] sm:$0xff]  ;;  %1705 = vmatpush2.bf16.msra.mxu0 %v4385_v46  ;;  %v117_v38 = vld [vmem:[#allocation5 + $0xe8] sm:$0xff] }
  0x77   :  { %v296_v44 = vld [vmem:[#allocation5 + $0x680] sm:$0xff]  ;;  %v4378_v48 = vcombine.high %v168_v42, %v172_v43  ;;  %1745 = vmatprep.subr.bf16.mxu1 %v4514_v41  ;;  %v4377_v56 = vcombine.low %v168_v42, %v172_v43  ;;  %v241_v39 = vld [vmem:[#allocation5 + $0x4c8] sm:$0xff]  ;;  %v4331_v42 = vcombine.low %v121_v29, %v125_v30  ;;  %v4459_v43 = vcombine.low %v249_v31, %v253_v33 }
  0x78   :  { %v300_v45 = vld [vmem:[#allocation5 + $0x6a0] sm:$0xff]  ;;  %1746 = vmatpush2.bf16.msra.mxu1 %v4513_v47  ;;  %v245_v41 = vld [vmem:[#allocation5 + $0x4e8] sm:$0xff] }
  0x79   :  { %v4506_v49 = vcombine.high %v296_v44, %v300_v45  ;;  %v160_v50 = vld [vmem:[#allocation5 + $0x240] sm:$0xff]  ;;  %1706 = vmatprep.subr.bf16.mxu0 %v4378_v48  ;;  %v4505_v57 = vcombine.low %v296_v44, %v300_v45  ;;  %v4324_v44 = vcombine.high %v113_v37, %v117_v38  ;;  %v105_v45 = vld [vmem:[#allocation5 + $0x88] sm:$0xff]  ;;  %v4452_v48 = vcombine.high %v241_v39, %v245_v41 }
  0x7a   :  { %v164_v51 = vld [vmem:[#allocation5 + $0x260] sm:$0xff]  ;;  %1707 = vmatpush2.bf16.msra.mxu0 %v4377_v56  ;;  %v109_v46 = vld [vmem:[#allocation5 + $0xa8] sm:$0xff] }
  0x7b   :  { %v288_v52 = vld [vmem:[#allocation5 + $0x640] sm:$0xff]  ;;  %v4370_v60 = vcombine.high %v160_v50, %v164_v51  ;;  %1747 = vmatprep.subr.bf16.mxu1 %v4506_v49  ;;  %v4369_v2 = vcombine.low %v160_v50, %v164_v51  ;;  %v233_v47 = vld [vmem:[#allocation5 + $0x488] sm:$0xff]  ;;  %v4323_v50 = vcombine.low %v113_v37, %v117_v38  ;;  %v4451_v51 = vcombine.low %v241_v39, %v245_v41 }
  0x7c   :  { %v292_v55 = vld [vmem:[#allocation5 + $0x660] sm:$0xff]  ;;  %1748 = vmatpush2.bf16.msra.mxu1 %v4505_v57  ;;  %v237_v49 = vld [vmem:[#allocation5 + $0x4a8] sm:$0xff] }
  0x7d   :  { %v4498_v61 = vcombine.high %v288_v52, %v292_v55  ;;  %v152_v62 = vld [vmem:[#allocation5 + $0x200] sm:$0xff]  ;;  %1708 = vmatprep.subr.bf16.mxu0 %v4370_v60  ;;  %v4497_v3 = vcombine.low %v288_v52, %v292_v55  ;;  %v4316_v52 = vcombine.high %v105_v45, %v109_v46  ;;  %v97_v55 = vld [vmem:[#allocation5 + $0x48] sm:$0xff]  ;;  %v4444_v60 = vcombine.high %v233_v47, %v237_v49 }
  0x7e   :  { %v156_v63 = vld [vmem:[#allocation5 + $0x220] sm:$0xff]  ;;  %1709 = vmatpush2.bf16.msra.mxu0 %v4369_v2  ;;  %v101_v56 = vld [vmem:[#allocation5 + $0x68] sm:$0xff] }
  0x7f   :  { %v280_v0 = vld [vmem:[#allocation5 + $0x600] sm:$0xff]  ;;  %v4362_v4 = vcombine.high %v152_v62, %v156_v63  ;;  %1749 = vmatprep.subr.bf16.mxu1 %v4498_v61  ;;  %v4361_v10 = vcombine.low %v152_v62, %v156_v63  ;;  %v225_v57 = vld [vmem:[#allocation5 + $0x448] sm:$0xff]  ;;  %v4315_v62 = vcombine.low %v105_v45, %v109_v46  ;;  %v4443_v63 = vcombine.low %v233_v47, %v237_v49 }
  0x80   :  { %v284_v1 = vld [vmem:[#allocation5 + $0x620] sm:$0xff]  ;;  %1750 = vmatpush2.bf16.msra.mxu1 %v4497_v3  ;;  %v229_v61 = vld [vmem:[#allocation5 + $0x468] sm:$0xff]  ;;  %v4307_v6 = vcombine.low %v97_v55, %v101_v56 }
  0x81   :  { %v4490_v5 = vcombine.high %v280_v0, %v284_v1  ;;  %1710 = vmatprep.subr.bf16.mxu0 %v4362_v4  ;;  %v4489_v11 = vcombine.low %v280_v0, %v284_v1  ;;  %v4308_v0 = vcombine.high %v97_v55, %v101_v56  ;;  %v89_v1 = vld [vmem:[#allocation5 + $0x8] sm:$0xff]  ;;  %v4436_v4 = vcombine.high %v225_v57, %v229_v61 }
  0x82   :  { %1711 = vmatpush2.bf16.msra.mxu0 %v4361_v10  ;;  %v93_v2 = vld [vmem:[#allocation5 + $0x28] sm:$0xff]  ;;  %v4435_v7 = vcombine.low %v225_v57, %v229_v61 }
  0x83   :  { %1751 = vmatprep.subr.bf16.mxu1 %v4490_v5  ;;  %1762 = vmatprep.subr.bf16.mxu0 %v4356_v12  ;;  %v217_v3 = vld [vmem:[#allocation5 + $0x408] sm:$0xff]  ;;  %v4300_v8 = vcombine.high %v89_v1, %v93_v2  ;;  %v4299_v14 = vcombine.low %v89_v1, %v93_v2 }
  0x84   :  { %1752 = vmatpush2.bf16.msra.mxu1 %v4489_v11  ;;  %v221_v5 = vld [vmem:[#allocation5 + $0x428] sm:$0xff] }
  0x85   :  { %1803 = vmatprep.subr.bf16.mxu1 %v4484_v13  ;;  %1713 = vmatmul.mubr.bf16.vlgmr.msra.gmra.mxu0 %v5523_v16  ;;  %v209_v9 = vld [vmem:[#allocation5 + $0x3c8] sm:$0xff]  ;;  %v4428_v12 = vcombine.high %v217_v3, %v221_v5  ;;  %v4427_v15 = vcombine.low %v217_v3, %v221_v5 }
  0x86   :  { %1763 = vmatpush1.bf16.msra.mxu0 %v4355_v20  ;;  %1794 = vmatprep.mubr.bf16.mxu0 %v5513_v58  ;;  %v213_v10 = vld [vmem:[#allocation5 + $0x3e8] sm:$0xff] }
  0x87   :  { %1754 = vmatmul.mubr.bf16.vlgmr.msra.gmra.mxu1 %v5527_v19  ;;  %1764 = vmatprep.subr.bf16.mxu0 %v4348_v22  ;;  %v337_v11 = vld [vmem:[#allocation5 + $0x7c8] sm:$0xff]  ;;  %v4420_v17 = vcombine.high %v209_v9, %v213_v10  ;;  %v4419_v24 = vcombine.low %v209_v9, %v213_v10 }
  0x88   :  { %1804 = vmatpush1.bf16.msra.mxu1 %v4483_v21  ;;  %1835 = vmatprep.mubr.bf16.mxu1 %v5517_v59  ;;  %v341_v13 = vld [vmem:[#allocation5 + $0x7e8] sm:$0xff] }
  0x89   :  { %1805 = vmatprep.subr.bf16.mxu1 %v4476_v26  ;;  %v201_v18 = vld [vmem:[#allocation5 + $0x388] sm:$0xff]  ;;  %v4548_v22 = vcombine.high %v337_v11, %v341_v13  ;;  %v4547_v25 = vcombine.low %v337_v11, %v341_v13  ;;  %v146_v13 = vld [vmem:[#allocation5 + $0x1d0] sm:$0xff] }
  0x8a   :  { %1765 = vmatpush1.bf16.msra.mxu0 %v4347_v53  ;;  %v205_v20 = vld [vmem:[#allocation5 + $0x3a8] sm:$0xff] }
  0x8b   :  { %1766 = vmatprep.subr.bf16.mxu0 %v4340_v28  ;;  %v329_v21 = vld [vmem:[#allocation5 + $0x788] sm:$0xff]  ;;  %v4412_v26 = vcombine.high %v201_v18, %v205_v20  ;;  %v4411_v30 = vcombine.low %v201_v18, %v205_v20  ;;  %v278_v18 = vld [vmem:[#allocation5 + $0x5f0] sm:$0xff] }
  0x8c   :  { %1806 = vmatpush1.bf16.msra.mxu1 %v4475_v54  ;;  %v333_v23 = vld [vmem:[#allocation5 + $0x7a8] sm:$0xff] }
  0x8d   :  { %1807 = vmatprep.subr.bf16.mxu1 %v4468_v32  ;;  %v193_v27 = vld [vmem:[#allocation5 + $0x348] sm:$0xff]  ;;  %v4540_v28 = vcombine.high %v329_v21, %v333_v23  ;;  %v4539_v31 = vcombine.low %v329_v21, %v333_v23  ;;  %v138_v23 = vld [vmem:[#allocation5 + $0x190] sm:$0xff] }
  0x8e   :  { %1767 = vmatpush1.bf16.msra.mxu0 %v4339_v34  ;;  %v197_v53 = vld [vmem:[#allocation5 + $0x368] sm:$0xff] }
  0x8f   :  { %1768 = vmatprep.subr.bf16.mxu0 %v4332_v36  ;;  %v321_v54 = vld [vmem:[#allocation5 + $0x748] sm:$0xff]  ;;  %v4404_v32 = vcombine.high %v193_v27, %v197_v53  ;;  %v4403_v38 = vcombine.low %v193_v27, %v197_v53  ;;  %v270_v27 = vld [vmem:[#allocation5 + $0x5b0] sm:$0xff] }
  0x90   :  { %1808 = vmatpush1.bf16.msra.mxu1 %v4467_v35  ;;  %v325_v29 = vld [vmem:[#allocation5 + $0x768] sm:$0xff] }
  0x91   :  { %1809 = vmatprep.subr.bf16.mxu1 %v4460_v40  ;;  %v185_v33 = vld [vmem:[#allocation5 + $0x308] sm:$0xff]  ;;  %v4532_v36 = vcombine.high %v321_v54, %v325_v29  ;;  %v4531_v39 = vcombine.low %v321_v54, %v325_v29  ;;  %v130_v54 = vld [vmem:[#allocation5 + $0x150] sm:$0xff] }
  0x92   :  { %1769 = vmatpush1.bf16.msra.mxu0 %v4331_v42  ;;  %v189_v34 = vld [vmem:[#allocation5 + $0x328] sm:$0xff] }
  0x93   :  { %1770 = vmatprep.subr.bf16.mxu0 %v4324_v44  ;;  %v313_v35 = vld [vmem:[#allocation5 + $0x708] sm:$0xff]  ;;  %v4396_v40 = vcombine.high %v185_v33, %v189_v34  ;;  %v4395_v46 = vcombine.low %v185_v33, %v189_v34  ;;  %v262_v33 = vld [vmem:[#allocation5 + $0x570] sm:$0xff] }
  0x94   :  { %1810 = vmatpush1.bf16.msra.mxu1 %v4459_v43  ;;  %v317_v37 = vld [vmem:[#allocation5 + $0x728] sm:$0xff] }
  0x95   :  { %1811 = vmatprep.subr.bf16.mxu1 %v4452_v48  ;;  %v177_v41 = vld [vmem:[#allocation5 + $0x2c8] sm:$0xff]  ;;  %v4524_v44 = vcombine.high %v313_v35, %v317_v37  ;;  %v4523_v47 = vcombine.low %v313_v35, %v317_v37  ;;  %v122_v35 = vld [vmem:[#allocation5 + $0x110] sm:$0xff] }
  0x96   :  { %1771 = vmatpush1.bf16.msra.mxu0 %v4323_v50  ;;  %v181_v42 = vld [vmem:[#allocation5 + $0x2e8] sm:$0xff] }
  0x97   :  { %1772 = vmatprep.subr.bf16.mxu0 %v4316_v52  ;;  %v305_v43 = vld [vmem:[#allocation5 + $0x6c8] sm:$0xff]  ;;  %v4388_v48 = vcombine.high %v177_v41, %v181_v42  ;;  %v4387_v56 = vcombine.low %v177_v41, %v181_v42  ;;  %v254_v41 = vld [vmem:[#allocation5 + $0x530] sm:$0xff] }
  0x98   :  { %1812 = vmatpush1.bf16.msra.mxu1 %v4451_v51  ;;  %v309_v45 = vld [vmem:[#allocation5 + $0x6e8] sm:$0xff] }
  0x99   :  { %1813 = vmatprep.subr.bf16.mxu1 %v4444_v60  ;;  %v169_v49 = vld [vmem:[#allocation5 + $0x288] sm:$0xff]  ;;  %v4516_v52 = vcombine.high %v305_v43, %v309_v45  ;;  %v4515_v57 = vcombine.low %v305_v43, %v309_v45  ;;  %v114_v43 = vld [vmem:[#allocation5 + $0xd0] sm:$0xff] }
  0x9a   :  { %1773 = vmatpush1.bf16.msra.mxu0 %v4315_v62  ;;  %v173_v50 = vld [vmem:[#allocation5 + $0x2a8] sm:$0xff] }
  0x9b   :  { %1774 = vmatprep.subr.bf16.mxu0 %v4308_v0  ;;  %v297_v51 = vld [vmem:[#allocation5 + $0x688] sm:$0xff]  ;;  %v4380_v60 = vcombine.high %v169_v49, %v173_v50  ;;  %v4379_v2 = vcombine.low %v169_v49, %v173_v50  ;;  %v246_v49 = vld [vmem:[#allocation5 + $0x4f0] sm:$0xff] }
  0x9c   :  { %1814 = vmatpush1.bf16.msra.mxu1 %v4443_v63  ;;  %v301_v55 = vld [vmem:[#allocation5 + $0x6a8] sm:$0xff] }
  0x9d   :  { %1815 = vmatprep.subr.bf16.mxu1 %v4436_v4  ;;  %v161_v61 = vld [vmem:[#allocation5 + $0x248] sm:$0xff]  ;;  %v4508_v0 = vcombine.high %v297_v51, %v301_v55  ;;  %v4507_v3 = vcombine.low %v297_v51, %v301_v55 }
  0x9e   :  { %1775 = vmatpush1.bf16.msra.mxu0 %v4307_v6  ;;  %v165_v62 = vld [vmem:[#allocation5 + $0x268] sm:$0xff] }
  0x9f   :  { %1776 = vmatprep.subr.bf16.mxu0 %v4300_v8  ;;  %v289_v63 = vld [vmem:[#allocation5 + $0x648] sm:$0xff]  ;;  %v4372_v4 = vcombine.high %v161_v61, %v165_v62  ;;  %v4371_v10 = vcombine.low %v161_v61, %v165_v62  ;;  %v238_v61 = vld [vmem:[#allocation5 + $0x4b0] sm:$0xff] }
  0xa0   :  { %1816 = vmatpush1.bf16.msra.mxu1 %v4435_v7  ;;  %v293_v1 = vld [vmem:[#allocation5 + $0x668] sm:$0xff] }
  0xa1   :  { %1817 = vmatprep.subr.bf16.mxu1 %v4428_v12  ;;  %v153_v5 = vld [vmem:[#allocation5 + $0x208] sm:$0xff]  ;;  %v4500_v8 = vcombine.high %v289_v63, %v293_v1  ;;  %v4499_v11 = vcombine.low %v289_v63, %v293_v1  ;;  %v98_v63 = vld [vmem:[#allocation5 + $0x50] sm:$0xff] }
  0xa2   :  { %1777 = vmatpush1.bf16.msra.mxu0 %v4299_v14  ;;  %v157_v6 = vld [vmem:[#allocation5 + $0x228] sm:$0xff]  ;;  %v150_v14 = vld [vmem:[#allocation5 + $0x1f0] sm:$0xff] }
  0xa3   :  { %1778 = vmatprep.subr.bf16.mxu0 %v4420_v17  ;;  %v281_v7 = vld [vmem:[#allocation5 + $0x608] sm:$0xff]  ;;  %v4364_v12 = vcombine.high %v153_v5, %v157_v6  ;;  %v4363_v20 = vcombine.low %v153_v5, %v157_v6  ;;  %v4357_v53 = vcombine.low %v146_v13, %v150_v14 }
  0xa4   :  { %1818 = vmatpush1.bf16.msra.mxu1 %v4427_v15  ;;  %v285_v9 = vld [vmem:[#allocation5 + $0x628] sm:$0xff]  ;;  %v274_v15 = vld [vmem:[#allocation5 + $0x5d0] sm:$0xff] }
  0xa5   :  { %1819 = vmatprep.subr.bf16.mxu1 %v4548_v22  ;;  %v4492_v17 = vcombine.high %v281_v7, %v285_v9  ;;  %v4491_v21 = vcombine.low %v281_v7, %v285_v9  ;;  %v4358_v22 = vcombine.high %v146_v13, %v150_v14  ;;  %v90_v7 = vld [vmem:[#allocation5 + $0x10] sm:$0xff] }
  0xa6   :  { %1779 = vmatpush2.bf16.msra.mxu0 %v4419_v24  ;;  %v142_v24 = vld [vmem:[#allocation5 + $0x1b0] sm:$0xff] }
  0xa7   :  { %1780 = vmatprep.subr.bf16.mxu0 %v4412_v26  ;;  %v4486_v26 = vcombine.high %v274_v15, %v278_v18  ;;  %v4350_v29 = vcombine.high %v138_v23, %v142_v24  ;;  %v4349_v34 = vcombine.low %v138_v23, %v142_v24 }
  0xa8   :  { %1820 = vmatpush2.bf16.msra.mxu1 %v4547_v25  ;;  %v266_v25 = vld [vmem:[#allocation5 + $0x590] sm:$0xff] }
  0xa9   :  { %1821 = vmatprep.subr.bf16.mxu1 %v4540_v28  ;;  %v4485_v28 = vcombine.low %v274_v15, %v278_v18  ;;  %v4477_v37 = vcombine.low %v266_v25, %v270_v27  ;;  %v210_v15 = vld [vmem:[#allocation5 + $0x3d0] sm:$0xff] }
  0xaa   :  { %1781 = vmatpush2.bf16.msra.mxu0 %v4411_v30  ;;  %v134_v30 = vld [vmem:[#allocation5 + $0x170] sm:$0xff] }
  0xab   :  { %1782 = vmatprep.subr.bf16.mxu0 %v4404_v32  ;;  %v258_v32 = vld [vmem:[#allocation5 + $0x550] sm:$0xff]  ;;  %v4341_v42 = vcombine.low %v130_v54, %v134_v30 }
  0xac   :  { %1822 = vmatpush2.bf16.msra.mxu1 %v4539_v31  ;;  %v4478_v31 = vcombine.high %v266_v25, %v270_v27  ;;  %v4469_v45 = vcombine.low %v258_v32, %v262_v33  ;;  %v202_v25 = vld [vmem:[#allocation5 + $0x390] sm:$0xff] }
  0xad   :  { %1823 = vmatprep.subr.bf16.mxu1 %v4532_v36  ;;  %v126_v36 = vld [vmem:[#allocation5 + $0x130] sm:$0xff] }
  0xae   :  { %1783 = vmatpush2.bf16.msra.mxu0 %v4403_v38  ;;  %v4342_v38 = vcombine.high %v130_v54, %v134_v30  ;;  %v4333_v50 = vcombine.low %v122_v35, %v126_v36  ;;  %v330_v54 = vld [vmem:[#allocation5 + $0x790] sm:$0xff] }
  0xaf   :  { %1784 = vmatprep.subr.bf16.mxu0 %v4396_v40  ;;  %v250_v40 = vld [vmem:[#allocation5 + $0x510] sm:$0xff] }
  0xb0   :  { %1824 = vmatpush2.bf16.msra.mxu1 %v4531_v39  ;;  %v4470_v39 = vcombine.high %v258_v32, %v262_v33  ;;  %v4461_v51 = vcombine.low %v250_v40, %v254_v41  ;;  %v198_v32 = vld [vmem:[#allocation5 + $0x370] sm:$0xff] }
  0xb1   :  { %1825 = vmatprep.subr.bf16.mxu1 %v4524_v44  ;;  %v118_v44 = vld [vmem:[#allocation5 + $0xf0] sm:$0xff] }
  0xb2   :  { %1785 = vmatpush2.bf16.msra.mxu0 %v4395_v46  ;;  %v4334_v46 = vcombine.high %v122_v35, %v126_v36  ;;  %v4325_v62 = vcombine.low %v114_v43, %v118_v44  ;;  %v322_v35 = vld [vmem:[#allocation5 + $0x750] sm:$0xff] }
  0xb3   :  { %1786 = vmatprep.subr.bf16.mxu0 %v4388_v48  ;;  %v242_v48 = vld [vmem:[#allocation5 + $0x4d0] sm:$0xff] }
  0xb4   :  { %1826 = vmatpush2.bf16.msra.mxu1 %v4523_v47  ;;  %v4462_v47 = vcombine.high %v250_v40, %v254_v41  ;;  %v4454_v55 = vcombine.high %v242_v48, %v246_v49  ;;  %v4453_v1 = vcombine.low %v242_v48, %v246_v49  ;;  %v326_v36 = vld [vmem:[#allocation5 + $0x770] sm:$0xff] }
  0xb5   :  { %1827 = vmatprep.subr.bf16.mxu1 %v4516_v52  ;;  %v4326_v52 = vcombine.high %v114_v43, %v118_v44  ;;  %v190_v40 = vld [vmem:[#allocation5 + $0x330] sm:$0xff]  ;;  %v4533_v49 = vcombine.low %v322_v35, %v326_v36 }
  0xb6   :  { %1787 = vmatpush2.bf16.msra.mxu0 %v4387_v56  ;;  %v106_v56 = vld [vmem:[#allocation5 + $0x90] sm:$0xff] }
  0xb7   :  { %1788 = vmatprep.subr.bf16.mxu0 %v4380_v60  ;;  %v234_v60 = vld [vmem:[#allocation5 + $0x490] sm:$0xff] }
  0xb8   :  { %1828 = vmatpush2.bf16.msra.mxu1 %v4515_v57  ;;  %v110_v57 = vld [vmem:[#allocation5 + $0xb0] sm:$0xff]  ;;  %v4446_v5 = vcombine.high %v234_v60, %v238_v61  ;;  %v4445_v9 = vcombine.low %v234_v60, %v238_v61 }
  0xb9   :  { %1829 = vmatprep.subr.bf16.mxu1 %v4508_v0  ;;  %v102_v0 = vld [vmem:[#allocation5 + $0x70] sm:$0xff]  ;;  %v4317_v6 = vcombine.low %v106_v56, %v110_v57 }
  0xba   :  { %1789 = vmatpush2.bf16.msra.mxu0 %v4379_v2  ;;  %v4318_v2 = vcombine.high %v106_v56, %v110_v57  ;;  %v4309_v14 = vcombine.low %v98_v63, %v102_v0  ;;  %v314_v43 = vld [vmem:[#allocation5 + $0x710] sm:$0xff] }
  0xbb   :  { %1790 = vmatprep.subr.bf16.mxu0 %v4372_v4  ;;  %v230_v4 = vld [vmem:[#allocation5 + $0x470] sm:$0xff] }
  0xbc   :  { %1830 = vmatpush2.bf16.msra.mxu1 %v4507_v3  ;;  %v226_v3 = vld [vmem:[#allocation5 + $0x450] sm:$0xff] }
  0xbd   :  { %1831 = vmatprep.subr.bf16.mxu1 %v4500_v8  ;;  %v94_v8 = vld [vmem:[#allocation5 + $0x30] sm:$0xff]  ;;  %v4438_v13 = vcombine.high %v226_v3, %v230_v4  ;;  %v4437_v18 = vcombine.low %v226_v3, %v230_v4 }
  0xbe   :  { %1791 = vmatpush2.bf16.msra.mxu0 %v4371_v10  ;;  %v4310_v10 = vcombine.high %v98_v63, %v102_v0  ;;  %v4301_v24 = vcombine.low %v90_v7, %v94_v8  ;;  %v318_v44 = vld [vmem:[#allocation5 + $0x730] sm:$0xff] }
  0xbf   :  { %1792 = vmatprep.subr.bf16.mxu0 %v4364_v12  ;;  %v222_v12 = vld [vmem:[#allocation5 + $0x430] sm:$0xff]  ;;  %v4525_v61 = vcombine.low %v314_v43, %v318_v44 }
  0xc0   :  { %1832 = vmatpush2.bf16.msra.mxu1 %v4499_v11  ;;  %v218_v11 = vld [vmem:[#allocation5 + $0x410] sm:$0xff] }
  0xc1   :  { %1833 = vmatprep.subr.bf16.mxu1 %v4492_v17  ;;  %v214_v17 = vld [vmem:[#allocation5 + $0x3f0] sm:$0xff]  ;;  %v4430_v23 = vcombine.high %v218_v11, %v222_v12  ;;  %v4429_v27 = vcombine.low %v218_v11, %v222_v12 }
  0xc2   :  { %1793 = vmatpush2.bf16.msra.mxu0 %v4363_v20  ;;  %v4302_v20 = vcombine.high %v90_v7, %v94_v8  ;;  %v4421_v30 = vcombine.low %v210_v15, %v214_v17  ;;  %v182_v48 = vld [vmem:[#allocation5 + $0x2f0] sm:$0xff] }
  0xc3   :  { %1844 = vmatprep.subr.bf16.mxu0 %v4358_v22  ;;  %v342_v22 = vld [vmem:[#allocation5 + $0x7f0] sm:$0xff] }
  0xc4   :  { %1834 = vmatpush2.bf16.msra.mxu1 %v4491_v21  ;;  %v338_v21 = vld [vmem:[#allocation5 + $0x7d0] sm:$0xff] }
  0xc5   :  { %1885 = vmatprep.subr.bf16.mxu1 %v4486_v26  ;;  %1795 = vmatmul.mubr.bf16.vlgmr.msra.gmra.mxu0 %v5523_v16  ;;  %v206_v26 = vld [vmem:[#allocation5 + $0x3b0] sm:$0xff]  ;;  %v4549_v33 = vcombine.low %v338_v21, %v342_v22 }
  0xc6   :  { %1845 = vmatpush1.bf16.msra.mxu0 %v4357_v53  ;;  %1876 = vmatprep.mubr.bf16.mxu0 %v5513_v58  ;;  %v4422_v53 = vcombine.high %v210_v15, %v214_v17  ;;  %v170_v57 = vld [vmem:[#allocation5 + $0x290] sm:$0xff] }
  0xc7   :  { %1836 = vmatmul.mubr.bf16.vlgmr.msra.gmra.mxu1 %v5527_v19  ;;  %1846 = vmatprep.subr.bf16.mxu0 %v4350_v29  ;;  %v4550_v29 = vcombine.high %v338_v21, %v342_v22  ;;  %v174_v60 = vld [vmem:[#allocation5 + $0x2b0] sm:$0xff]  ;;  %v147_v21 = vld [vmem:[#allocation5 + $0x1d8] sm:$0xff] }
  0xc8   :  { %1886 = vmatpush1.bf16.msra.mxu1 %v4485_v28  ;;  %1917 = vmatprep.mubr.bf16.mxu1 %v5517_v59  ;;  %v334_v28 = vld [vmem:[#allocation5 + $0x7b0] sm:$0xff]  ;;  %v151_v22 = vld [vmem:[#allocation5 + $0x1f8] sm:$0xff] }
  0xc9   :  { %1887 = vmatprep.subr.bf16.mxu1 %v4478_v31  ;;  %v194_v31 = vld [vmem:[#allocation5 + $0x350] sm:$0xff]  ;;  %v4541_v41 = vcombine.low %v330_v54, %v334_v28 }
  0xca   :  { %1847 = vmatpush1.bf16.msra.mxu0 %v4349_v34  ;;  %v4414_v34 = vcombine.high %v202_v25, %v206_v26  ;;  %v298_v63 = vld [vmem:[#allocation5 + $0x690] sm:$0xff] }
  0xcb   :  { %1848 = vmatprep.subr.bf16.mxu0 %v4342_v38  ;;  %v4413_v38 = vcombine.low %v202_v25, %v206_v26  ;;  %v302_v0 = vld [vmem:[#allocation5 + $0x6b0] sm:$0xff]  ;;  %v275_v25 = vld [vmem:[#allocation5 + $0x5d8] sm:$0xff] }
  0xcc   :  { %1888 = vmatpush1.bf16.msra.mxu1 %v4477_v37  ;;  %v4542_v37 = vcombine.high %v330_v54, %v334_v28  ;;  %v162_v3 = vld [vmem:[#allocation5 + $0x250] sm:$0xff]  ;;  %v279_v26 = vld [vmem:[#allocation5 + $0x5f8] sm:$0xff] }
  0xcd   :  { %1889 = vmatprep.subr.bf16.mxu1 %v4470_v39  ;;  %v186_v39 = vld [vmem:[#allocation5 + $0x310] sm:$0xff]  ;;  %v139_v54 = vld [vmem:[#allocation5 + $0x198] sm:$0xff] }
  0xce   :  { %1849 = vmatpush1.bf16.msra.mxu0 %v4341_v42  ;;  %v4406_v42 = vcombine.high %v194_v31, %v198_v32  ;;  %v4397_v56 = vcombine.low %v186_v39, %v190_v40  ;;  %v166_v4 = vld [vmem:[#allocation5 + $0x270] sm:$0xff]  ;;  %v143_v28 = vld [vmem:[#allocation5 + $0x1b8] sm:$0xff] }
  0xcf   :  { %1850 = vmatprep.subr.bf16.mxu0 %v4334_v46  ;;  %v4405_v46 = vcombine.low %v194_v31, %v198_v32  ;;  %v290_v7 = vld [vmem:[#allocation5 + $0x650] sm:$0xff]  ;;  %v267_v31 = vld [vmem:[#allocation5 + $0x598] sm:$0xff] }
  0xd0   :  { %1890 = vmatpush1.bf16.msra.mxu1 %v4469_v45  ;;  %v4534_v45 = vcombine.high %v322_v35, %v326_v36  ;;  %v294_v8 = vld [vmem:[#allocation5 + $0x670] sm:$0xff]  ;;  %v271_v32 = vld [vmem:[#allocation5 + $0x5b8] sm:$0xff]  ;;  %v4487_v36 = vcombine.low %v275_v25, %v279_v26 }
  0xd1   :  { %1891 = vmatprep.subr.bf16.mxu1 %v4462_v47  ;;  %v178_v47 = vld [vmem:[#allocation5 + $0x2d0] sm:$0xff]  ;;  %v131_v35 = vld [vmem:[#allocation5 + $0x158] sm:$0xff] }
  0xd2   :  { %1851 = vmatpush1.bf16.msra.mxu0 %v4333_v50  ;;  %v4398_v50 = vcombine.high %v186_v39, %v190_v40  ;;  %v154_v11 = vld [vmem:[#allocation5 + $0x210] sm:$0xff]  ;;  %v135_v39 = vld [vmem:[#allocation5 + $0x178] sm:$0xff] }
  0xd3   :  { %1852 = vmatprep.subr.bf16.mxu0 %v4326_v52  ;;  %v310_v52 = vld [vmem:[#allocation5 + $0x6f0] sm:$0xff]  ;;  %v259_v40 = vld [vmem:[#allocation5 + $0x558] sm:$0xff] }
  0xd4   :  { %1892 = vmatpush1.bf16.msra.mxu1 %v4461_v51  ;;  %v306_v51 = vld [vmem:[#allocation5 + $0x6d0] sm:$0xff] }
  0xd5   :  { %1893 = vmatprep.subr.bf16.mxu1 %v4454_v55  ;;  %v4526_v55 = vcombine.high %v314_v43, %v318_v44  ;;  %v158_v12 = vld [vmem:[#allocation5 + $0x230] sm:$0xff]  ;;  %v123_v43 = vld [vmem:[#allocation5 + $0x118] sm:$0xff] }
  0xd6   :  { %1853 = vmatpush1.bf16.msra.mxu0 %v4325_v62  ;;  %v4390_v62 = vcombine.high %v178_v47, %v182_v48  ;;  %v282_v15 = vld [vmem:[#allocation5 + $0x610] sm:$0xff]  ;;  %v127_v44 = vld [vmem:[#allocation5 + $0x138] sm:$0xff] }
  0xd7   :  { %1854 = vmatprep.subr.bf16.mxu0 %v4318_v2  ;;  %v4389_v2 = vcombine.low %v178_v47, %v182_v48  ;;  %v286_v17 = vld [vmem:[#allocation5 + $0x630] sm:$0xff]  ;;  %v251_v48 = vld [vmem:[#allocation5 + $0x518] sm:$0xff] }
  0xd8   :  { %1894 = vmatpush1.bf16.msra.mxu1 %v4453_v1  ;;  %v4518_v1 = vcombine.high %v306_v51, %v310_v52 }
  0xd9   :  { %1895 = vmatprep.subr.bf16.mxu1 %v4446_v5  ;;  %v4517_v5 = vcombine.low %v306_v51, %v310_v52  ;;  %v115_v51 = vld [vmem:[#allocation5 + $0xd8] sm:$0xff] }
  0xda   :  { %1855 = vmatpush1.bf16.msra.mxu0 %v4317_v6  ;;  %v4382_v6 = vcombine.high %v170_v57, %v174_v60  ;;  %v119_v52 = vld [vmem:[#allocation5 + $0xf8] sm:$0xff] }
  0xdb   :  { %1856 = vmatprep.subr.bf16.mxu0 %v4310_v10  ;;  %v4381_v10 = vcombine.low %v170_v57, %v174_v60  ;;  %v243_v60 = vld [vmem:[#allocation5 + $0x4d8] sm:$0xff] }
  0xdc   :  { %1896 = vmatpush1.bf16.msra.mxu1 %v4445_v9  ;;  %v4510_v9 = vcombine.high %v298_v63, %v302_v0 }
  0xdd   :  { %1897 = vmatprep.subr.bf16.mxu1 %v4438_v13  ;;  %v4509_v13 = vcombine.low %v298_v63, %v302_v0  ;;  %v4328_v63 = vcombine.high %v115_v51, %v119_v52  ;;  %v107_v0 = vld [vmem:[#allocation5 + $0x98] sm:$0xff] }
  0xde   :  { %1857 = vmatpush1.bf16.msra.mxu0 %v4309_v14  ;;  %v4374_v14 = vcombine.high %v162_v3, %v166_v4 }
  0xdf   :  { %1858 = vmatprep.subr.bf16.mxu0 %v4302_v20  ;;  %v4373_v20 = vcombine.low %v162_v3, %v166_v4  ;;  %v239_v3 = vld [vmem:[#allocation5 + $0x4b8] sm:$0xff]  ;;  %v4327_v4 = vcombine.low %v115_v51, %v119_v52 }
  0xe0   :  { %1898 = vmatpush1.bf16.msra.mxu1 %v4437_v18  ;;  %v4502_v18 = vcombine.high %v290_v7, %v294_v8  ;;  %v319_v51 = vld [vmem:[#allocation5 + $0x738] sm:$0xff] }
  0xe1   :  { %1899 = vmatprep.subr.bf16.mxu1 %v4430_v23  ;;  %v4501_v23 = vcombine.low %v290_v7, %v294_v8 }
  0xe2   :  { %1859 = vmatpush1.bf16.msra.mxu0 %v4301_v24  ;;  %v4366_v24 = vcombine.high %v154_v11, %v158_v12 }
  0xe3   :  { %1860 = vmatprep.subr.bf16.mxu0 %v4422_v53  ;;  %v4365_v53 = vcombine.low %v154_v11, %v158_v12 }
  0xe4   :  { %1900 = vmatpush1.bf16.msra.mxu1 %v4429_v27  ;;  %v4494_v27 = vcombine.high %v282_v15, %v286_v17 }
  0xe5   :  { %1901 = vmatprep.subr.bf16.mxu1 %v4550_v29  ;;  %v4493_v29 = vcombine.low %v282_v15, %v286_v17 }
  0xe6   :  { %1861 = vmatpush2.bf16.msra.mxu0 %v4421_v30  ;;  %v4360_v30 = vcombine.high %v147_v21, %v151_v22 }
  0xe7   :  { %1862 = vmatprep.subr.bf16.mxu0 %v4414_v34  ;;  %v4359_v34 = vcombine.low %v147_v21, %v151_v22 }
  0xe8   :  { %1902 = vmatpush2.bf16.msra.mxu1 %v4549_v33  ;;  %v4488_v33 = vcombine.high %v275_v25, %v279_v26 }
  0xe9   :  { %1903 = vmatprep.subr.bf16.mxu1 %v4542_v37  ;;  %v4352_v37 = vcombine.high %v139_v54, %v143_v28 }
  0xea   :  { %1863 = vmatpush2.bf16.msra.mxu0 %v4413_v38  ;;  %v4480_v38 = vcombine.high %v267_v31, %v271_v32 }
  0xeb   :  { %1864 = vmatprep.subr.bf16.mxu0 %v4406_v42  ;;  %v4351_v42 = vcombine.low %v139_v54, %v143_v28  ;;  %v343_v54 = vld [vmem:[#allocation5 + $0x7f8] sm:$0xff] }
  0xec   :  { %1904 = vmatpush2.bf16.msra.mxu1 %v4541_v41  ;;  %v263_v41 = vld [vmem:[#allocation5 + $0x578] sm:$0xff] }
  0xed   :  { %1905 = vmatprep.subr.bf16.mxu1 %v4534_v45  ;;  %v4479_v45 = vcombine.low %v267_v31, %v271_v32  ;;  %v4472_v47 = vcombine.high %v259_v40, %v263_v41  ;;  %v203_v32 = vld [vmem:[#allocation5 + $0x398] sm:$0xff] }
  0xee   :  { %1865 = vmatpush2.bf16.msra.mxu0 %v4405_v46  ;;  %v4344_v46 = vcombine.high %v131_v35, %v135_v39 }
  0xef   :  { %1866 = vmatprep.subr.bf16.mxu0 %v4398_v50  ;;  %v4343_v50 = vcombine.low %v131_v35, %v135_v39  ;;  %v335_v35 = vld [vmem:[#allocation5 + $0x7b8] sm:$0xff] }
  0xf0   :  { %1906 = vmatpush2.bf16.msra.mxu1 %v4533_v49  ;;  %v255_v49 = vld [vmem:[#allocation5 + $0x538] sm:$0xff] }
  0xf1   :  { %1907 = vmatprep.subr.bf16.mxu1 %v4526_v55  ;;  %v4471_v55 = vcombine.low %v259_v40, %v263_v41  ;;  %v4464_v57 = vcombine.high %v251_v48, %v255_v49  ;;  %v195_v40 = vld [vmem:[#allocation5 + $0x358] sm:$0xff] }
  0xf2   :  { %1867 = vmatpush2.bf16.msra.mxu0 %v4397_v56  ;;  %v4336_v56 = vcombine.high %v123_v43, %v127_v44  ;;  %v199_v41 = vld [vmem:[#allocation5 + $0x378] sm:$0xff] }
  0xf3   :  { %1868 = vmatprep.subr.bf16.mxu0 %v4390_v62  ;;  %v4335_v62 = vcombine.low %v123_v43, %v127_v44  ;;  %v327_v43 = vld [vmem:[#allocation5 + $0x778] sm:$0xff]  ;;  %v4407_v52 = vcombine.low %v195_v40, %v199_v41 }
  0xf4   :  { %1908 = vmatpush2.bf16.msra.mxu1 %v4525_v61  ;;  %v247_v61 = vld [vmem:[#allocation5 + $0x4f8] sm:$0xff] }
  0xf5   :  { %1909 = vmatprep.subr.bf16.mxu1 %v4518_v1  ;;  %v111_v1 = vld [vmem:[#allocation5 + $0xb8] sm:$0xff]  ;;  %v4455_v7 = vcombine.low %v243_v60, %v247_v61 }
  0xf6   :  { %1869 = vmatpush2.bf16.msra.mxu0 %v4389_v2  ;;  %v235_v2 = vld [vmem:[#allocation5 + $0x498] sm:$0xff]  ;;  %v4320_v8 = vcombine.high %v107_v0, %v111_v1  ;;  %v4319_v12 = vcombine.low %v107_v0, %v111_v1 }
  0xf7   :  { %1870 = vmatprep.subr.bf16.mxu0 %v4382_v6  ;;  %v103_v6 = vld [vmem:[#allocation5 + $0x78] sm:$0xff]  ;;  %v4448_v11 = vcombine.high %v235_v2, %v239_v3  ;;  %v4447_v15 = vcombine.low %v235_v2, %v239_v3 }
  0xf8   :  { %1910 = vmatpush2.bf16.msra.mxu1 %v4517_v5  ;;  %v99_v5 = vld [vmem:[#allocation5 + $0x58] sm:$0xff] }
  0xf9   :  { %1911 = vmatprep.subr.bf16.mxu1 %v4510_v9  ;;  %v227_v9 = vld [vmem:[#allocation5 + $0x458] sm:$0xff]  ;;  %v4312_v17 = vcombine.high %v99_v5, %v103_v6  ;;  %v4311_v22 = vcombine.low %v99_v5, %v103_v6 }
  0xfa   :  { %1871 = vmatpush2.bf16.msra.mxu0 %v4381_v10  ;;  %v231_v10 = vld [vmem:[#allocation5 + $0x478] sm:$0xff] }
  0xfb   :  { %1872 = vmatprep.subr.bf16.mxu0 %v4374_v14  ;;  %v95_v14 = vld [vmem:[#allocation5 + $0x38] sm:$0xff]  ;;  %v4440_v21 = vcombine.high %v227_v9, %v231_v10  ;;  %v4439_v25 = vcombine.low %v227_v9, %v231_v10 }
  0xfc   :  { %1912 = vmatpush2.bf16.msra.mxu1 %v4509_v13  ;;  %v91_v13 = vld [vmem:[#allocation5 + $0x18] sm:$0xff] }
  0xfd   :  { %1913 = vmatprep.subr.bf16.mxu1 %v4502_v18  ;;  %v219_v18 = vld [vmem:[#allocation5 + $0x418] sm:$0xff]  ;;  %v4304_v26 = vcombine.high %v91_v13, %v95_v14  ;;  %v4303_v28 = vcombine.low %v91_v13, %v95_v14 }
  0xfe   :  { %1873 = vmatpush2.bf16.msra.mxu0 %v4373_v20  ;;  %v223_v20 = vld [vmem:[#allocation5 + $0x438] sm:$0xff] }
  0xff   :  { %1874 = vmatprep.subr.bf16.mxu0 %v4366_v24  ;;  %v215_v24 = vld [vmem:[#allocation5 + $0x3f8] sm:$0xff] }
 0x100   :  { %1914 = vmatpush2.bf16.msra.mxu1 %v4501_v23  ;;  %v211_v23 = vld [vmem:[#allocation5 + $0x3d8] sm:$0xff] }
 0x101   :  { %1915 = vmatprep.subr.bf16.mxu1 %v4494_v27  ;;  %v339_v27 = vld [vmem:[#allocation5 + $0x7d8] sm:$0xff] }
 0x102   :  { %1875 = vmatpush2.bf16.msra.mxu0 %v4365_v53  ;;  %v4432_v53 = vcombine.high %v219_v18, %v223_v20  ;;  %v4552_v31 = vcombine.high %v339_v27, %v343_v54  ;;  %v171_v2 = vld [vmem:[#allocation5 + $0x298] sm:$0xff] }
 0x103   :  { %1926 = vmatprep.subr.bf16.mxu0 %v4360_v30  ;;  %v4424_v30 = vcombine.high %v211_v23, %v215_v24  ;;  %v175_v3 = vld [vmem:[#allocation5 + $0x2b8] sm:$0xff] }
 0x104   :  { %1916 = vmatpush2.bf16.msra.mxu1 %v4493_v29  ;;  %v4431_v29 = vcombine.low %v219_v18, %v223_v20  ;;  %v303_v5 = vld [vmem:[#allocation5 + $0x6b8] sm:$0xff]  ;;  %v4383_v14 = vcombine.low %v171_v2, %v175_v3 }
 0x105   :  { %1967 = vmatprep.subr.bf16.mxu1 %v4488_v33  ;;  %1877 = vmatmul.mubr.bf16.vlgmr.msra.gmra.mxu0 %v5523_v16  ;;  %v207_v33 = vld [vmem:[#allocation5 + $0x3b8] sm:$0xff] }
 0x106   :  { %1927 = vmatpush1.bf16.msra.mxu0 %v4359_v34  ;;  %1958 = vmatprep.mubr.bf16.mxu0 %v5513_v58  ;;  %v4463_v58 = vcombine.low %v251_v48, %v255_v49  ;;  %v331_v34 = vld [vmem:[#allocation5 + $0x798] sm:$0xff]  ;;  %v4415_v44 = vcombine.low %v203_v32, %v207_v33 }
 0x107   :  { %1918 = vmatmul.mubr.bf16.vlgmr.msra.gmra.mxu1 %v5527_v19  ;;  %1928 = vmatprep.subr.bf16.mxu0 %v4352_v37  ;;  %v4551_v37 = vcombine.low %v339_v27, %v343_v54  ;;  %v4544_v39 = vcombine.high %v331_v34, %v335_v35  ;;  %v187_v48 = vld [vmem:[#allocation5 + $0x318] sm:$0xff] }
 0x108   :  { %1968 = vmatpush1.bf16.msra.mxu1 %v4487_v36  ;;  %1999 = vmatprep.mubr.bf16.mxu1 %v5517_v59  ;;  %v4456_v59 = vcombine.high %v243_v60, %v247_v61  ;;  %v4423_v36 = vcombine.low %v211_v23, %v215_v24  ;;  %v191_v49 = vld [vmem:[#allocation5 + $0x338] sm:$0xff] }
 0x109   :  { %1969 = vmatprep.subr.bf16.mxu1 %v4480_v38  ;;  %v4416_v38 = vcombine.high %v203_v32, %v207_v33  ;;  %v179_v60 = vld [vmem:[#allocation5 + $0x2d8] sm:$0xff]  ;;  %v4916_v32 = vld [vmem:[#allocation7 + $0x2e4] ss:$16 sps:$4 sm:$0xff]  }
 0x10a   :  { %1929 = vmatpush1.bf16.msra.mxu0 %v4351_v42  ;;  %v323_v42 = vld [vmem:[#allocation5 + $0x758] sm:$0xff]  ;;  %v5545_v33 = vld [vmem:[#allocation10] sm:$0xff] }
 0x10b   :  { %1930 = vmatprep.subr.bf16.mxu0 %v4344_v46  ;;  %v4408_v46 = vcombine.high %v195_v40, %v199_v41  ;;  %v183_v61 = vld [vmem:[#allocation5 + $0x2f8] sm:$0xff]  ;;  %v4905_v41 = vld [vmem:[#allocation7 + $0xc0] ss:$16 sps:$4 sm:$0xff]  }
 0x10c   :  { %1970 = vmatpush1.bf16.msra.mxu1 %v4479_v45  ;;  %v4543_v45 = vcombine.low %v331_v34, %v335_v35  ;;  %v4391_v6 = vcombine.low %v179_v60, %v183_v61  ;;  %v163_v10 = vld [vmem:[#allocation5 + $0x258] sm:$0xff]  ;;  %v4902_v34 = vld [vmem:[#allocation7 + $0xe0] ss:$16 sps:$4 sm:$0xff]   ;;  %v4907_v35 = vld [vmem:[#allocation7 + $0xc4] ss:$16 sps:$4 sm:$0xff]  }
 0x10d   :  { %1971 = vmatprep.subr.bf16.mxu1 %v4472_v47  ;;  %v4536_v47 = vcombine.high %v323_v42, %v327_v43  ;;  %v295_v13 = vld [vmem:[#allocation5 + $0x678] sm:$0xff] }
 0x10e   :  { %1931 = vmatpush1.bf16.msra.mxu0 %v4343_v50  ;;  %v315_v50 = vld [vmem:[#allocation5 + $0x718] sm:$0xff] }
 0x10f   :  { %1932 = vmatprep.subr.bf16.mxu0 %v4336_v56  ;;  %v4400_v56 = vcombine.high %v187_v48, %v191_v49  ;;  %v4527_v0 = vcombine.low %v315_v50, %v319_v51  ;;  %v155_v20 = vld [vmem:[#allocation5 + $0x218] sm:$0xff] }
 0x110   :  { %1972 = vmatpush1.bf16.msra.mxu1 %v4471_v55  ;;  %v4535_v55 = vcombine.low %v323_v42, %v327_v43  ;;  %v283_v23 = vld [vmem:[#allocation5 + $0x618] sm:$0xff]  ;;  %v4910_v43 = vld [vmem:[#allocation7 + $0xa4] ss:$16 sps:$4 sm:$0xff]  }
 0x111   :  { %1973 = vmatprep.subr.bf16.mxu1 %v4464_v57  ;;  %v4528_v57 = vcombine.high %v315_v50, %v319_v51  ;;  %v287_v24 = vld [vmem:[#allocation5 + $0x638] sm:$0xff] }
 0x112   :  { %1933 = vmatpush1.bf16.msra.mxu0 %v4335_v62  ;;  %v307_v62 = vld [vmem:[#allocation5 + $0x6d8] sm:$0xff] }
 0x113   :  { %1934 = vmatprep.subr.bf16.mxu0 %v4328_v63  ;;  %v4399_v63 = vcombine.low %v187_v48, %v191_v49 }
 0x114   :  { %1974 = vmatpush1.bf16.msra.mxu1 %v4463_v58  ;;  %v311_v58 = vld [vmem:[#allocation5 + $0x6f8] sm:$0xff] }
 0x115   :  { %1975 = vmatprep.subr.bf16.mxu1 %v4456_v59  ;;  %v4392_v59 = vcombine.high %v179_v60, %v183_v61  ;;  %v4520_v1 = vcombine.high %v307_v62, %v311_v58  ;;  %v4911_v61 = vld [vmem:[#allocation7 + $0x80] ss:$16 sps:$4 sm:$0xff]  }
 0x116   :  { %1935 = vmatpush1.bf16.msra.mxu0 %v4327_v4  ;;  %v299_v4 = vld [vmem:[#allocation5 + $0x698] sm:$0xff] }
 0x117   :  { %1936 = vmatprep.subr.bf16.mxu0 %v4320_v8  ;;  %v4384_v8 = vcombine.high %v171_v2, %v175_v3  ;;  %v4512_v9 = vcombine.high %v299_v4, %v303_v5  ;;  %v4946_v2 = vld [vmem:[#allocation7 + $0x244] ss:$16 sps:$4 sm:$0xff]   ;;  %v4923_v3 = vld [vmem:[#allocation7 + $0x40] ss:$16 sps:$4 sm:$0xff]  }
 0x118   :  { %1976 = vmatpush1.bf16.msra.mxu1 %v4455_v7  ;;  %v4519_v7 = vcombine.low %v307_v62, %v311_v58  ;;  %v4919_v62 = vld [vmem:[#allocation7 + $0x64] ss:$16 sps:$4 sm:$0xff]   ;;  %v4932_v58 = vld [vmem:[#allocation7 + $0x280] ss:$16 sps:$4 sm:$0xff]  }
 0x119   :  { %1977 = vmatprep.subr.bf16.mxu1 %v4448_v11  ;;  %v167_v11 = vld [vmem:[#allocation5 + $0x278] sm:$0xff] }
 0x11a   :  { %1937 = vmatpush1.bf16.msra.mxu0 %v4319_v12  ;;  %v291_v12 = vld [vmem:[#allocation5 + $0x658] sm:$0xff] }
 0x11b   :  { %1938 = vmatprep.subr.bf16.mxu0 %v4312_v17  ;;  %v4376_v17 = vcombine.high %v163_v10, %v167_v11  ;;  %v4504_v18 = vcombine.high %v291_v12, %v295_v13 }
 0x11c   :  { %1978 = vmatpush1.bf16.msra.mxu1 %v4447_v15  ;;  %v4511_v15 = vcombine.low %v299_v4, %v303_v5  ;;  %v4931_v4 = vld [vmem:[#allocation7 + $0x24] ss:$16 sps:$4 sm:$0xff]   ;;  %v4944_v5 = vld [vmem:[#allocation7 + $0x240] ss:$16 sps:$4 sm:$0xff]  }
 0x11d   :  { %1979 = vmatprep.subr.bf16.mxu1 %v4440_v21  ;;  %v159_v21 = vld [vmem:[#allocation5 + $0x238] sm:$0xff] }
 0x11e   :  { %1939 = vmatpush1.bf16.msra.mxu0 %v4311_v22  ;;  %v346_v22 = vlaneseq  ;;  %v4368_v27 = vcombine.high %v155_v20, %v159_v21 }
 0x11f   :  { %1940 = vmatprep.subr.bf16.mxu0 %v4304_v26  ;;  %v4503_v26 = vcombine.low %v291_v12, %v295_v13  ;;  %v4943_v12 = vld [vmem:[#allocation7 + $0x1e4] ss:$16 sps:$4 sm:$0xff]   ;;  %v4956_v13 = vld [vmem:[#allocation7 + $0x200] ss:$16 sps:$4 sm:$0xff]  }
 0x120   :  { %1980 = vmatpush1.bf16.msra.mxu1 %v4439_v25  ;;  %v4375_v25 = vcombine.low %v163_v10, %v167_v11  ;;  %v5542_v54 = vshrl.u32 %v346_v22, 7  ;;  %v4958_v10 = vld [vmem:[#allocation7 + $0x204] ss:$16 sps:$4 sm:$0xff]   ;;  %v4935_v11 = vld [vmem:[#allocation7] ss:$16 sps:$4 sm:$0xff]  }
 0x121   :  { %1981 = vmatprep.subr.bf16.mxu1 %v4432_v53  ;;  %v4496_v53 = vcombine.high %v283_v23, %v287_v24 }
 0x122   :  { %1941 = vmatpush1.bf16.msra.mxu0 %v4303_v28  ;;  %v4367_v28 = vcombine.low %v155_v20, %v159_v21  ;;  %v4970_v20 = vld [vmem:[#allocation7 + $0x3c4] ss:$16 sps:$4 sm:$0xff]   ;;  %v4947_v21 = vld [vmem:[#allocation7 + $0x1c0] ss:$16 sps:$4 sm:$0xff]  }
 0x123   :  { %1942 = vmatprep.subr.bf16.mxu0 %v4424_v30  ;;  %v4904_v30 = vld [vmem:[#allocation7 + $0xe4] ss:$16 sps:$4 sm:$0xff]  }
 0x124   :  { %1982 = vmatpush1.bf16.msra.mxu1 %v4431_v29  ;;  %v4495_v29 = vcombine.low %v283_v23, %v287_v24  ;;  %v4955_v23 = vld [vmem:[#allocation7 + $0x1a4] ss:$16 sps:$4 sm:$0xff]   ;;  %v4968_v24 = vld [vmem:[#allocation7 + $0x3c0] ss:$16 sps:$4 sm:$0xff]  }
 0x125   :  { %1983 = vmatprep.subr.bf16.mxu1 %v4552_v31  ;;  %v352_v31 = vsub.s32 1, %v5542_v54 }
 0x126   :  { %1943 = vmatpush2.bf16.msra.mxu0 %v4423_v36  ;;  %v4914_v36 = vld [vmem:[#allocation7 + $0x2e0] ss:$16 sps:$4 sm:$0xff]  }
 0x127   :  { %1944 = vmatprep.subr.bf16.mxu0 %v4416_v38  ;;  %v4922_v38 = vld [vmem:[#allocation7 + $0x2c4] ss:$16 sps:$4 sm:$0xff]  }
 0x128   :  { %1984 = vmatpush2.bf16.msra.mxu1 %v4551_v37  ;;  %v353_v37 = vrot.slane %v5545_v33, %v352_v31 }
 0x129   :  { %1985 = vmatprep.subr.bf16.mxu1 %v4544_v39 }
 0x12a   :  { %1945 = vmatpush2.bf16.msra.mxu0 %v4415_v44  ;;  %v4920_v44 = vld [vmem:[#allocation7 + $0x2c0] ss:$16 sps:$4 sm:$0xff]  }
 0x12b   :  { %1946 = vmatprep.subr.bf16.mxu0 %v4408_v46 }
 0x12c   :  { %1986 = vmatpush2.bf16.msra.mxu1 %v4543_v45 }
 0x12d   :  { %1987 = vmatprep.subr.bf16.mxu1 %v4536_v47  ;;  %v4928_v47 = vld [vmem:[#allocation7 + $0x2a4] ss:$16 sps:$4 sm:$0xff]  }
 0x12e   :  { %1947 = vmatpush2.bf16.msra.mxu0 %v4407_v52  ;;  %v4913_v52 = vld [vmem:[#allocation7 + $0x84] ss:$16 sps:$4 sm:$0xff]  }
 0x12f   :  { %1948 = vmatprep.subr.bf16.mxu0 %v4400_v56 }
 0x130   :  { %1988 = vmatpush2.bf16.msra.mxu1 %v4535_v55 }
 0x131   :  { %1989 = vmatprep.subr.bf16.mxu1 %v4528_v57  ;;  %v4934_v57 = vld [vmem:[#allocation7 + $0x284] ss:$16 sps:$4 sm:$0xff]  }
 0x132   :  { %1949 = vmatpush2.bf16.msra.mxu0 %v4399_v63  ;;  %v4940_v63 = vld [vmem:[#allocation7 + $0x264] ss:$16 sps:$4 sm:$0xff]  }
 0x133   :  { %1950 = vmatprep.subr.bf16.mxu0 %v4392_v59  ;;  %v4925_v59 = vld [vmem:[#allocation7 + $0x44] ss:$16 sps:$4 sm:$0xff]  }
 0x134   :  { %1990 = vmatpush2.bf16.msra.mxu1 %v4527_v0  ;;  %v4917_v0 = vld [vmem:[#allocation7 + $0x60] ss:$16 sps:$4 sm:$0xff]  }
 0x135   :  { %1991 = vmatprep.subr.bf16.mxu1 %v4520_v1  ;;  %v4938_v1 = vld [vmem:[#allocation7 + $0x260] ss:$16 sps:$4 sm:$0xff]  }
 0x136   :  { %1951 = vmatpush2.bf16.msra.mxu0 %v4391_v6  ;;  %v4952_v6 = vld [vmem:[#allocation7 + $0x224] ss:$16 sps:$4 sm:$0xff]  }
 0x137   :  { %1952 = vmatprep.subr.bf16.mxu0 %v4384_v8  ;;  %v4937_v8 = vld [vmem:[#allocation7 + $0x4] ss:$16 sps:$4 sm:$0xff]  }
 0x138   :  { %1992 = vmatpush2.bf16.msra.mxu1 %v4519_v7  ;;  %v4929_v7 = vld [vmem:[#allocation7 + $0x20] ss:$16 sps:$4 sm:$0xff]  }
 0x139   :  { %1993 = vmatprep.subr.bf16.mxu1 %v4512_v9  ;;  %v4950_v9 = vld [vmem:[#allocation7 + $0x220] ss:$16 sps:$4 sm:$0xff]  }
 0x13a   :  { %1953 = vmatpush2.bf16.msra.mxu0 %v4383_v14  ;;  %v4964_v14 = vld [vmem:[#allocation7 + $0x3e4] ss:$16 sps:$4 sm:$0xff]  }
 0x13b   :  { %1954 = vmatprep.subr.bf16.mxu0 %v4376_v17  ;;  %v4949_v17 = vld [vmem:[#allocation7 + $0x1c4] ss:$16 sps:$4 sm:$0xff]  }
 0x13c   :  { %1994 = vmatpush2.bf16.msra.mxu1 %v4511_v15  ;;  %v4941_v15 = vld [vmem:[#allocation7 + $0x1e0] ss:$16 sps:$4 sm:$0xff]  }
 0x13d   :  { %1995 = vmatprep.subr.bf16.mxu1 %v4504_v18  ;;  %v4962_v18 = vld [vmem:[#allocation7 + $0x3e0] ss:$16 sps:$4 sm:$0xff]  }
 0x13e   :  { %1955 = vmatpush2.bf16.msra.mxu0 %v4375_v25  ;;  %v4976_v25 = vld [vmem:[#allocation7 + $0x3a4] ss:$16 sps:$4 sm:$0xff]  }
 0x13f   :  { %1956 = vmatprep.subr.bf16.mxu0 %v4368_v27  ;;  %v4961_v27 = vld [vmem:[#allocation7 + $0x184] ss:$16 sps:$4 sm:$0xff]  }
 0x140   :  { %1996 = vmatpush2.bf16.msra.mxu1 %v4503_v26  ;;  %v4953_v26 = vld [vmem:[#allocation7 + $0x1a0] ss:$16 sps:$4 sm:$0xff]  }
 0x141   :  { %1997 = vmatprep.subr.bf16.mxu1 %v4496_v53  ;;  %v4974_v53 = vld [vmem:[#allocation7 + $0x3a0] ss:$16 sps:$4 sm:$0xff]  }
 0x142   :  { %1957 = vmatpush2.bf16.msra.mxu0 %v4367_v28  ;;  %v4982_v28 = vld [vmem:[#allocation7 + $0x384] ss:$16 sps:$4 sm:$0xff]  }
 0x143   :  { %3582 = vmatprep.subr.bf16.mxu0 %v4904_v30  ;;  %v348_v30 = vsub.s32 0, %v5542_v54 }
 0x144   :  { %1998 = vmatpush2.bf16.msra.mxu1 %v4495_v29  ;;  %v4959_v29 = vld [vmem:[#allocation7 + $0x180] ss:$16 sps:$4 sm:$0xff]  }
 0x145   :  { %3623 = vmatprep.subr.bf16.mxu1 %v4916_v32  ;;  %v5550_v39 = vpop.f32.mrf.mxu0  ;;  %1959 = vmatmul.mubr.bf16.vlgmr.msra.gmra.mxu0 %v5523_v16  ;;  %v4908_v16 = vld [vmem:[#allocation7 + $0xa0] ss:$16 sps:$4 sm:$0xff]   ;;  %v4967_v32 = vld [vmem:[#allocation7 + $0x164] ss:$16 sps:$4 sm:$0xff]  }
 0x146   :  { %3583 = vmatpush1.bf16.msra.mxu0 %v4902_v34  ;;  %v4980_v34 = vld [vmem:[#allocation7 + $0x380] ss:$16 sps:$4 sm:$0xff]  }
 0x147   :  { %v5553_v40 = vpop.f32.mrf.mxu1  ;;  %2000 = vmatmul.mubr.bf16.vlgmr.msra.gmra.mxu1 %v5527_v19  ;;  %v1716_v42 = vpop.f32.mrf.mxu0  ;;  %3584 = vmatprep.subr.bf16.mxu0 %v4907_v35  ;;  %v4926_v19 = vld [vmem:[#allocation7 + $0x2a0] ss:$16 sps:$4 sm:$0xff]   ;;  %v4988_v35 = vld [vmem:[#allocation7 + $0x364] ss:$16 sps:$4 sm:$0xff]  }
 0x148   :  { %3624 = vmatpush1.bf16.msra.mxu1 %v4914_v36  ;;  %v1717_v45 = vadd.f32 %v1716_v42, %v353_v37  ;;  %v4965_v36 = vld [vmem:[#allocation7 + $0x160] ss:$16 sps:$4 sm:$0xff]   ;;  %v349_v37 = vrot.slane %v5545_v33, %v348_v30  ;;  %v4991_v42 = vld [vmem:[#allocation7 + $0x344] ss:$16 sps:$4 sm:$0xff]  }
 0x149   :  { %v1757_v46 = vpop.f32.mrf.mxu1  ;;  %3625 = vmatprep.subr.bf16.mxu1 %v4922_v38  ;;  %v1718_v48 = vpop.f32.mrf.mxu0  ;;  %v4973_v38 = vld [vmem:[#allocation7 + $0x144] ss:$16 sps:$4 sm:$0xff]  }
 0x14a   :  { %v1758_v49 = vadd.f32 %v1757_v46, %v1717_v45  ;;  %3585 = vmatpush1.bf16.msra.mxu0 %v4905_v41  ;;  %v4986_v41 = vld [vmem:[#allocation7 + $0x360] ss:$16 sps:$4 sm:$0xff]   ;;  %v4979_v45 = vld [vmem:[#allocation7 + $0x124] ss:$16 sps:$4 sm:$0xff]  }
 0x14b   :  { %v1759_v50 = vpop.f32.mrf.mxu1  ;;  %v1719_v51 = vpop.f32.mrf.mxu0  ;;  %3586 = vmatprep.subr.bf16.mxu0 %v4910_v43  ;;  %v4971_v43 = vld [vmem:[#allocation7 + $0x140] ss:$16 sps:$4 sm:$0xff]  }
 0x14c   :  { %3626 = vmatpush1.bf16.msra.mxu1 %v4920_v44  ;;  %v2009_v55 = vmax.f32 %v1758_v49, 0.0  ;;  %v1715_v44 = vadd.f32 %v5550_v39, %v349_v37  ;;  %v4989_v46 = vld [vmem:[#allocation7 + $0x340] ss:$16 sps:$4 sm:$0xff]   ;;  %v4985_v50 = vld [vmem:[#allocation7 + $0x104] ss:$16 sps:$4 sm:$0xff]   ;;  %v356_v39 = vsub.s32 2, %v5542_v54 }
 0x14d   :  { %v1760_v56 = vpop.f32.mrf.mxu1  ;;  %3627 = vmatprep.subr.bf16.mxu1 %v4928_v47  ;;  %v4994_v47 = vld [vmem:[#allocation7 + $0x324] ss:$16 sps:$4 sm:$0xff]   ;;  %v4977_v48 = vld [vmem:[#allocation7 + $0x120] ss:$16 sps:$4 sm:$0xff]  }
 0x14e   :  { %v5556_v60 = vpack.c.bf16 %v2009_v55, %v2009_v55  ;;  %3587 = vmatpush1.bf16.msra.mxu0 %v4908_v16  ;;  %v1756_v49 = vadd.f32 %v5553_v40, %v1715_v44  ;;  %v4992_v16 = vld [vmem:[#allocation7 + $0x320] ss:$16 sps:$4 sm:$0xff]   ;;  %v4997_v51 = vld [vmem:[#allocation7 + $0x304] ss:$16 sps:$4 sm:$0xff]   ;;  %v357_v40 = vrot.slane %v5545_v33, %v356_v39 }
 0x14f   :  { %3588 = vmatprep.subr.bf16.mxu0 %v4913_v52  ;;  %v4983_v52 = vld [vmem:[#allocation7 + $0x100] ss:$16 sps:$4 sm:$0xff]   ;;  %v5000_v56 = vld [vmem:[#allocation7 + $0x4e4] ss:$16 sps:$4 sm:$0xff]  }
 0x150   :  { %3628 = vmatpush1.bf16.msra.mxu1 %v4926_v19  ;;  %3614 = vmatprep.mubr.bf16.mxu0 %v5556_v60  ;;  %v2008_v19 = vmax.f32 %v1756_v49, 0.0  ;;  %v4995_v55 = vld [vmem:[#allocation7 + $0x300] ss:$16 sps:$4 sm:$0xff]   ;;  %v5027_v49 = vld [vmem:[#allocation7 + $0x5c4] ss:$16 sps:$4 sm:$0xff]  }
 0x151   :  { %3629 = vmatprep.subr.bf16.mxu1 %v4934_v57  ;;  %v360_v57 = vsub.s32 3, %v5542_v54  ;;  %v5016_v37 = vld [vmem:[#allocation7 + $0x420] ss:$16 sps:$4 sm:$0xff]  }
 0x152   :  { %3589 = vmatpush1.bf16.msra.mxu0 %v4911_v61  ;;  %v5048_v61 = vld [vmem:[#allocation7 + $0x6e4] ss:$16 sps:$4 sm:$0xff]   ;;  %v5070_v44 = vld [vmem:[#allocation7 + $0x660] ss:$16 sps:$4 sm:$0xff]  }
 0x153   :  { %3590 = vmatprep.subr.bf16.mxu0 %v4919_v62  ;;  %v4998_v62 = vld [vmem:[#allocation7 + $0x4e0] ss:$16 sps:$4 sm:$0xff]  }
 0x154   :  { %3630 = vmatpush1.bf16.msra.mxu1 %v4932_v58  ;;  %v5570_v58 = vpack.c.bf16 %v2008_v19, %v2008_v19  ;;  %v5090_v19 = vld [vmem:[#allocation7 + $0x604] ss:$16 sps:$4 sm:$0xff]  }
 0x155   :  { %3631 = vmatprep.subr.bf16.mxu1 %v4940_v63  ;;  %v5003_v63 = vld [vmem:[#allocation7 + $0x4c4] ss:$16 sps:$4 sm:$0xff]  }
 0x156   :  { %3591 = vmatpush1.bf16.msra.mxu0 %v4917_v0  ;;  %v361_v0 = vrot.slane %v5545_v33, %v360_v57 }
 0x157   :  { %3592 = vmatprep.subr.bf16.mxu0 %v4925_v59 }
 0x158   :  { %3632 = vmatpush1.bf16.msra.mxu1 %v4938_v1 }
 0x159   :  { %3633 = vmatprep.subr.bf16.mxu1 %v4946_v2 }
 0x15a   :  { %3593 = vmatpush1.bf16.msra.mxu0 %v4923_v3  ;;  %v5001_v3 = vld [vmem:[#allocation7 + $0x4c0] ss:$16 sps:$4 sm:$0xff]  }
 0x15b   :  { %3594 = vmatprep.subr.bf16.mxu0 %v4931_v4 }
 0x15c   :  { %3634 = vmatpush1.bf16.msra.mxu1 %v4944_v5  ;;  %v5006_v5 = vld [vmem:[#allocation7 + $0x4a4] ss:$16 sps:$4 sm:$0xff]  }
 0x15d   :  { %3635 = vmatprep.subr.bf16.mxu1 %v4952_v6 }
 0x15e   :  { %3595 = vmatpush1.bf16.msra.mxu0 %v4929_v7 }
 0x15f   :  { %3596 = vmatprep.subr.bf16.mxu0 %v4937_v8 }
 0x160   :  { %3636 = vmatpush1.bf16.msra.mxu1 %v4950_v9 }
 0x161   :  { %3637 = vmatprep.subr.bf16.mxu1 %v4958_v10 }
 0x162   :  { %3597 = vmatpush1.bf16.msra.mxu0 %v4935_v11 }
 0x163   :  { %3598 = vmatprep.subr.bf16.mxu0 %v4943_v12  ;;  %v5004_v12 = vld [vmem:[#allocation7 + $0x4a0] ss:$16 sps:$4 sm:$0xff]  }
 0x164   :  { %3638 = vmatpush1.bf16.msra.mxu1 %v4956_v13 }
 0x165   :  { %3639 = vmatprep.subr.bf16.mxu1 %v4964_v14 }
 0x166   :  { %3599 = vmatpush2.bf16.msra.mxu0 %v4941_v15  ;;  %v5009_v15 = vld [vmem:[#allocation7 + $0x484] ss:$16 sps:$4 sm:$0xff]  }
 0x167   :  { %3600 = vmatprep.subr.bf16.mxu0 %v4949_v17 }
 0x168   :  { %3640 = vmatpush2.bf16.msra.mxu1 %v4962_v18 }
 0x169   :  { %3641 = vmatprep.subr.bf16.mxu1 %v4970_v20 }
 0x16a   :  { %3601 = vmatpush2.bf16.msra.mxu0 %v4947_v21  ;;  %v5007_v21 = vld [vmem:[#allocation7 + $0x480] ss:$16 sps:$4 sm:$0xff]  }
 0x16b   :  { %3602 = vmatprep.subr.bf16.mxu0 %v4955_v23  ;;  %v5046_v23 = vld [vmem:[#allocation7 + $0x6e0] ss:$16 sps:$4 sm:$0xff]  }
 0x16c   :  { %3642 = vmatpush2.bf16.msra.mxu1 %v4968_v24 }
 0x16d   :  { %3643 = vmatprep.subr.bf16.mxu1 %v4976_v25  ;;  %v5012_v25 = vld [vmem:[#allocation7 + $0x464] ss:$16 sps:$4 sm:$0xff]  }
 0x16e   :  { %3603 = vmatpush2.bf16.msra.mxu0 %v4953_v26  ;;  %v5054_v26 = vld [vmem:[#allocation7 + $0x6c4] ss:$16 sps:$4 sm:$0xff]  }
 0x16f   :  { %3604 = vmatprep.subr.bf16.mxu0 %v4961_v27  ;;  %v5010_v27 = vld [vmem:[#allocation7 + $0x460] ss:$16 sps:$4 sm:$0xff]  }
 0x170   :  { %3644 = vmatpush2.bf16.msra.mxu1 %v4974_v53  ;;  %v5052_v53 = vld [vmem:[#allocation7 + $0x6c0] ss:$16 sps:$4 sm:$0xff]  }
 0x171   :  { %3645 = vmatprep.subr.bf16.mxu1 %v4982_v28  ;;  %v5015_v28 = vld [vmem:[#allocation7 + $0x444] ss:$16 sps:$4 sm:$0xff]  }
 0x172   :  { %3605 = vmatpush2.bf16.msra.mxu0 %v4959_v29  ;;  %v5060_v29 = vld [vmem:[#allocation7 + $0x6a4] ss:$16 sps:$4 sm:$0xff]  }
 0x173   :  { %3606 = vmatprep.subr.bf16.mxu0 %v4967_v32  ;;  %v5013_v32 = vld [vmem:[#allocation7 + $0x440] ss:$16 sps:$4 sm:$0xff]  }
 0x174   :  { %3646 = vmatpush2.bf16.msra.mxu1 %v4980_v34  ;;  %v5058_v34 = vld [vmem:[#allocation7 + $0x6a0] ss:$16 sps:$4 sm:$0xff]  }
 0x175   :  { %3647 = vmatprep.subr.bf16.mxu1 %v4988_v35  ;;  %v5018_v35 = vld [vmem:[#allocation7 + $0x424] ss:$16 sps:$4 sm:$0xff]  }
 0x176   :  { %3607 = vmatpush2.bf16.msra.mxu0 %v4965_v36  ;;  %v5066_v36 = vld [vmem:[#allocation7 + $0x684] ss:$16 sps:$4 sm:$0xff]  }
 0x177   :  { %3608 = vmatprep.subr.bf16.mxu0 %v4973_v38  ;;  %v5064_v38 = vld [vmem:[#allocation7 + $0x680] ss:$16 sps:$4 sm:$0xff]  }
 0x178   :  { %3648 = vmatpush2.bf16.msra.mxu1 %v4986_v41  ;;  %v5021_v41 = vld [vmem:[#allocation7 + $0x404] ss:$16 sps:$4 sm:$0xff]  }
 0x179   :  { %3649 = vmatprep.subr.bf16.mxu1 %v4991_v42  ;;  %v5072_v42 = vld [vmem:[#allocation7 + $0x664] ss:$16 sps:$4 sm:$0xff]  }
 0x17a   :  { %3609 = vmatpush2.bf16.msra.mxu0 %v4971_v43  ;;  %v5019_v43 = vld [vmem:[#allocation7 + $0x400] ss:$16 sps:$4 sm:$0xff]  }
 0x17b   :  { %3610 = vmatprep.subr.bf16.mxu0 %v4979_v45  ;;  %v5024_v45 = vld [vmem:[#allocation7 + $0x5e4] ss:$16 sps:$4 sm:$0xff]  }
 0x17c   :  { %3650 = vmatpush2.bf16.msra.mxu1 %v4989_v46  ;;  %v5078_v46 = vld [vmem:[#allocation7 + $0x644] ss:$16 sps:$4 sm:$0xff]  }
 0x17d   :  { %3651 = vmatprep.subr.bf16.mxu1 %v4994_v47  ;;  %v5022_v47 = vld [vmem:[#allocation7 + $0x5e0] ss:$16 sps:$4 sm:$0xff]  }
 0x17e   :  { %3611 = vmatpush2.bf16.msra.mxu0 %v4977_v48  ;;  %v5076_v48 = vld [vmem:[#allocation7 + $0x640] ss:$16 sps:$4 sm:$0xff]  }
 0x17f   :  { %3612 = vmatprep.subr.bf16.mxu0 %v4985_v50  ;;  %v5084_v50 = vld [vmem:[#allocation7 + $0x624] ss:$16 sps:$4 sm:$0xff]  }
 0x180   :  { %3652 = vmatpush2.bf16.msra.mxu1 %v4992_v16  ;;  %v5025_v16 = vld [vmem:[#allocation7 + $0x5c0] ss:$16 sps:$4 sm:$0xff]  }
 0x181   :  { %3653 = vmatprep.subr.bf16.mxu1 %v4997_v51  ;;  %v5082_v51 = vld [vmem:[#allocation7 + $0x620] ss:$16 sps:$4 sm:$0xff]  }
 0x182   :  { %3613 = vmatpush2.bf16.msra.mxu0 %v4983_v52  ;;  %v5030_v52 = vld [vmem:[#allocation7 + $0x5a4] ss:$16 sps:$4 sm:$0xff]  }
 0x183   :  { %3664 = vmatprep.subr.bf16.mxu0 %v5000_v56  ;;  %v5088_v56 = vld [vmem:[#allocation7 + $0x600] ss:$16 sps:$4 sm:$0xff]  }
 0x184   :  { %3654 = vmatpush2.bf16.msra.mxu1 %v4995_v55  ;;  %v5028_v55 = vld [vmem:[#allocation7 + $0x5a0] ss:$16 sps:$4 sm:$0xff]  }
 0x185   :  { %3705 = vmatprep.subr.bf16.mxu1 %v5048_v61  ;;  %v1796_v59 = vpop.f32.mrf.mxu0  ;;  %3615 = vmatmul.mubr.bf16.vlgmr.msra.gmra.mxu0 %v5570_v58  ;;  %v5033_v61 = vld [vmem:[#allocation7 + $0x584] ss:$16 sps:$4 sm:$0xff]  }
 0x186   :  { %v1797_v1 = vadd.f32 %v1796_v59, %v357_v40  ;;  %3665 = vmatpush1.bf16.msra.mxu0 %v4998_v62  ;;  %v5096_v40 = vld [vmem:[#allocation7 + $0x7e4] ss:$16 sps:$4 sm:$0xff]   ;;  %v5031_v62 = vld [vmem:[#allocation7 + $0x580] ss:$16 sps:$4 sm:$0xff]  }
 0x187   :  { %v1837_v2 = vpop.f32.mrf.mxu1  ;;  %v1798_v4 = vpop.f32.mrf.mxu0  ;;  %3666 = vmatprep.subr.bf16.mxu0 %v5003_v63  ;;  %v5094_v63 = vld [vmem:[#allocation7 + $0x7e0] ss:$16 sps:$4 sm:$0xff]   ;;  %v5102_v59 = vld [vmem:[#allocation7 + $0x7c4] ss:$16 sps:$4 sm:$0xff]  }
 0x188   :  { %v1838_v6 = vadd.f32 %v1837_v2, %v1797_v1  ;;  %v1799_v7 = vadd.f32 %v1798_v4, %v361_v0  ;;  %v5036_v0 = vld [vmem:[#allocation7 + $0x564] ss:$16 sps:$4 sm:$0xff]   ;;  %v5034_v1 = vld [vmem:[#allocation7 + $0x560] ss:$16 sps:$4 sm:$0xff]  }
 0x189   :  { %v1839_v8 = vpop.f32.mrf.mxu1  ;;  %v1800_v9 = vpop.f32.mrf.mxu0  ;;  %v5100_v2 = vld [vmem:[#allocation7 + $0x7c0] ss:$16 sps:$4 sm:$0xff]   ;;  %v5108_v4 = vld [vmem:[#allocation7 + $0x7a4] ss:$16 sps:$4 sm:$0xff]  }
 0x18a   :  { %v1840_v10 = vadd.f32 %v1839_v8, %v1799_v7  ;;  %3667 = vmatpush1.bf16.msra.mxu0 %v5001_v3  ;;  %v2010_v13 = vmax.f32 %v1838_v6, 0.0  ;;  %v5039_v3 = vld [vmem:[#allocation7 + $0x544] ss:$16 sps:$4 sm:$0xff]   ;;  %v5106_v6 = vld [vmem:[#allocation7 + $0x7a0] ss:$16 sps:$4 sm:$0xff]  }
 0x18b   :  { %v1841_v11 = vpop.f32.mrf.mxu1  ;;  %v1801_v14 = vpop.f32.mrf.mxu0  ;;  %3668 = vmatprep.subr.bf16.mxu0 %v5006_v5  ;;  %v5037_v5 = vld [vmem:[#allocation7 + $0x540] ss:$16 sps:$4 sm:$0xff]   ;;  %v5042_v7 = vld [vmem:[#allocation7 + $0x524] ss:$16 sps:$4 sm:$0xff]  }
 0x18c   :  { %v2011_v17 = vmax.f32 %v1840_v10, 0.0  ;;  %v5578_v24 = vpack.c.bf16 %v2010_v13, %v2010_v13  ;;  %v5114_v8 = vld [vmem:[#allocation7 + $0x784] ss:$16 sps:$4 sm:$0xff]   ;;  %v5040_v9 = vld [vmem:[#allocation7 + $0x520] ss:$16 sps:$4 sm:$0xff]   ;;  %v364_v13 = vsub.s32 4, %v5542_v54 }
 0x18d   :  { %v1842_v18 = vpop.f32.mrf.mxu1  ;;  %v5112_v10 = vld [vmem:[#allocation7 + $0x780] ss:$16 sps:$4 sm:$0xff]   ;;  %v5045_v11 = vld [vmem:[#allocation7 + $0x504] ss:$16 sps:$4 sm:$0xff]  }
 0x18e   :  { %v5576_v20 = vpack.c.bf16 %v2011_v17, %v2011_v17  ;;  %3669 = vmatpush1.bf16.msra.mxu0 %v5004_v12  ;;  %v5120_v12 = vld [vmem:[#allocation7 + $0x764] ss:$16 sps:$4 sm:$0xff]   ;;  %v5043_v14 = vld [vmem:[#allocation7 + $0x500] ss:$16 sps:$4 sm:$0xff]   ;;  %v5051_v17 = vld [vmem:[#allocation7 + $0xec] ss:$16 sps:$4 sm:$0xff]  }
 0x18f   :  { %3670 = vmatprep.subr.bf16.mxu0 %v5009_v15  ;;  %v5118_v15 = vld [vmem:[#allocation7 + $0x760] ss:$16 sps:$4 sm:$0xff]   ;;  %v5126_v18 = vld [vmem:[#allocation7 + $0x744] ss:$16 sps:$4 sm:$0xff]  }
 0x190   :  { %3655 = vmatprep.mubr.bf16.mxu1 %v5576_v20 }
 0x191   :  { %3656 = vmatmul.mubr.bf16.vlgmr.msra.gmra.mxu1 %v5578_v24 }
 0x192   :  { %3671 = vmatpush1.bf16.msra.mxu0 %v5007_v21  ;;  %3706 = vmatpush1.bf16.msra.mxu1 %v5046_v23  ;;  %v368_v21 = vsub.s32 5, %v5542_v54  ;;  %v365_v23 = vrot.slane %v5545_v33, %v364_v13  ;;  %v5121_v13 = vld [vmem:[#allocation7 + $0x168] ss:$16 sps:$4 sm:$0xff]  }
 0x193   :  { %3672 = vmatprep.subr.bf16.mxu0 %v5012_v25  ;;  %3707 = vmatprep.subr.bf16.mxu1 %v5054_v26  ;;  %v5124_v25 = vld [vmem:[#allocation7 + $0x740] ss:$16 sps:$4 sm:$0xff]   ;;  %v5132_v26 = vld [vmem:[#allocation7 + $0x724] ss:$16 sps:$4 sm:$0xff]  }
 0x196   :  { %3673 = vmatpush1.bf16.msra.mxu0 %v5010_v27  ;;  %3708 = vmatpush1.bf16.msra.mxu1 %v5052_v53  ;;  %v369_v27 = vrot.slane %v5545_v33, %v368_v21 }
 0x197   :  { %3674 = vmatprep.subr.bf16.mxu0 %v5015_v28  ;;  %3709 = vmatprep.subr.bf16.mxu1 %v5060_v29 }
 0x19a   :  { %3675 = vmatpush1.bf16.msra.mxu0 %v5013_v32  ;;  %3710 = vmatpush1.bf16.msra.mxu1 %v5058_v34  ;;  %v5130_v32 = vld [vmem:[#allocation7 + $0x720] ss:$16 sps:$4 sm:$0xff]  }
 0x19b   :  { %3676 = vmatprep.subr.bf16.mxu0 %v5018_v35  ;;  %3711 = vmatprep.subr.bf16.mxu1 %v5066_v36  ;;  %v5138_v35 = vld [vmem:[#allocation7 + $0x704] ss:$16 sps:$4 sm:$0xff]  }
 0x19e   :  { %3677 = vmatpush1.bf16.msra.mxu0 %v5016_v37  ;;  %3712 = vmatpush1.bf16.msra.mxu1 %v5064_v38 }
 0x19f   :  { %3678 = vmatprep.subr.bf16.mxu0 %v5021_v41  ;;  %3713 = vmatprep.subr.bf16.mxu1 %v5072_v42 }
 0x1a2   :  { %3679 = vmatpush1.bf16.msra.mxu0 %v5019_v43  ;;  %3714 = vmatpush1.bf16.msra.mxu1 %v5070_v44  ;;  %v5136_v44 = vld [vmem:[#allocation7 + $0x700] ss:$16 sps:$4 sm:$0xff]  }
 0x1a3   :  { %3680 = vmatprep.subr.bf16.mxu0 %v5024_v45  ;;  %3715 = vmatprep.subr.bf16.mxu1 %v5078_v46 }
 0x1a6   :  { %3681 = vmatpush2.bf16.msra.mxu0 %v5022_v47  ;;  %3716 = vmatpush1.bf16.msra.mxu1 %v5076_v48  ;;  %v5144_v47 = vld [vmem:[#allocation7 + $0x2ec] ss:$16 sps:$4 sm:$0xff]  }
 0x1a7   :  { %3682 = vmatprep.subr.bf16.mxu0 %v5027_v49  ;;  %3717 = vmatprep.subr.bf16.mxu1 %v5084_v50 }
 0x1aa   :  { %3683 = vmatpush2.bf16.msra.mxu0 %v5025_v16  ;;  %3718 = vmatpush1.bf16.msra.mxu1 %v5082_v51  ;;  %v5049_v16 = vld [vmem:[#allocation7 + $0xe8] ss:$16 sps:$4 sm:$0xff]  }
 0x1ab   :  { %3684 = vmatprep.subr.bf16.mxu0 %v5030_v52  ;;  %3719 = vmatprep.subr.bf16.mxu1 %v5090_v19  ;;  %v5057_v52 = vld [vmem:[#allocation7 + $0xcc] ss:$16 sps:$4 sm:$0xff]   ;;  %v5055_v19 = vld [vmem:[#allocation7 + $0xc8] ss:$16 sps:$4 sm:$0xff]  }
 0x1ae   :  { %3685 = vmatpush2.bf16.msra.mxu0 %v5028_v55  ;;  %3720 = vmatpush1.bf16.msra.mxu1 %v5088_v56  ;;  %v5063_v55 = vld [vmem:[#allocation7 + $0xac] ss:$16 sps:$4 sm:$0xff]   ;;  %v5061_v56 = vld [vmem:[#allocation7 + $0xa8] ss:$16 sps:$4 sm:$0xff]  }
 0x1af   :  { %3686 = vmatprep.subr.bf16.mxu0 %v5033_v61  ;;  %3721 = vmatprep.subr.bf16.mxu1 %v5096_v40  ;;  %v5069_v61 = vld [vmem:[#allocation7 + $0x8c] ss:$16 sps:$4 sm:$0xff]   ;;  %v5067_v40 = vld [vmem:[#allocation7 + $0x88] ss:$16 sps:$4 sm:$0xff]  }
 0x1b2   :  { %3687 = vmatpush2.bf16.msra.mxu0 %v5031_v62  ;;  %3722 = vmatpush2.bf16.msra.mxu1 %v5094_v63  ;;  %v5075_v62 = vld [vmem:[#allocation7 + $0x6c] ss:$16 sps:$4 sm:$0xff]   ;;  %v5073_v63 = vld [vmem:[#allocation7 + $0x68] ss:$16 sps:$4 sm:$0xff]  }
 0x1b3   :  { %3688 = vmatprep.subr.bf16.mxu0 %v5036_v0  ;;  %3723 = vmatprep.subr.bf16.mxu1 %v5102_v59  ;;  %v5081_v0 = vld [vmem:[#allocation7 + $0x4c] ss:$16 sps:$4 sm:$0xff]   ;;  %v5079_v59 = vld [vmem:[#allocation7 + $0x48] ss:$16 sps:$4 sm:$0xff]  }
 0x1b6   :  { %3689 = vmatpush2.bf16.msra.mxu0 %v5034_v1  ;;  %3724 = vmatpush2.bf16.msra.mxu1 %v5100_v2  ;;  %v5087_v1 = vld [vmem:[#allocation7 + $0x2c] ss:$16 sps:$4 sm:$0xff]  }
 0x1b7   :  { %3690 = vmatprep.subr.bf16.mxu0 %v5039_v3  ;;  %3725 = vmatprep.subr.bf16.mxu1 %v5108_v4  ;;  %v5093_v2 = vld [vmem:[#allocation7 + $0xc] ss:$16 sps:$4 sm:$0xff]   ;;  %v5091_v3 = vld [vmem:[#allocation7 + $0x8] ss:$16 sps:$4 sm:$0xff]  }
 0x1b8   :  { %v5099_v4 = vld [vmem:[#allocation7 + $0x1ec] ss:$16 sps:$4 sm:$0xff]  }
 0x1ba   :  { %3691 = vmatpush2.bf16.msra.mxu0 %v5037_v5  ;;  %3726 = vmatpush2.bf16.msra.mxu1 %v5106_v6  ;;  %v5097_v5 = vld [vmem:[#allocation7 + $0x1e8] ss:$16 sps:$4 sm:$0xff]   ;;  %v5105_v6 = vld [vmem:[#allocation7 + $0x1cc] ss:$16 sps:$4 sm:$0xff]  }
 0x1bb   :  { %3692 = vmatprep.subr.bf16.mxu0 %v5042_v7  ;;  %3727 = vmatprep.subr.bf16.mxu1 %v5114_v8  ;;  %v5103_v7 = vld [vmem:[#allocation7 + $0x1c8] ss:$16 sps:$4 sm:$0xff]   ;;  %v5111_v8 = vld [vmem:[#allocation7 + $0x1ac] ss:$16 sps:$4 sm:$0xff]  }
 0x1be   :  { %3693 = vmatpush2.bf16.msra.mxu0 %v5040_v9  ;;  %3728 = vmatpush2.bf16.msra.mxu1 %v5112_v10  ;;  %v5109_v9 = vld [vmem:[#allocation7 + $0x1a8] ss:$16 sps:$4 sm:$0xff]   ;;  %v5117_v10 = vld [vmem:[#allocation7 + $0x18c] ss:$16 sps:$4 sm:$0xff]  }
 0x1bf   :  { %3694 = vmatprep.subr.bf16.mxu0 %v5045_v11  ;;  %3729 = vmatprep.subr.bf16.mxu1 %v5120_v12  ;;  %v5115_v11 = vld [vmem:[#allocation7 + $0x188] ss:$16 sps:$4 sm:$0xff]   ;;  %v5123_v12 = vld [vmem:[#allocation7 + $0x16c] ss:$16 sps:$4 sm:$0xff]  }
 0x1c2   :  { %3695 = vmatpush2.bf16.msra.mxu0 %v5043_v14  ;;  %3730 = vmatpush2.bf16.msra.mxu1 %v5118_v15  ;;  %v372_v14 = vsub.s32 6, %v5542_v54  ;;  %v5129_v15 = vld [vmem:[#allocation7 + $0x14c] ss:$16 sps:$4 sm:$0xff]  }
 0x1c3   :  { %3746 = vmatprep.subr.bf16.mxu0 %v5051_v17  ;;  %3731 = vmatprep.subr.bf16.mxu1 %v5126_v18  ;;  %v376_v17 = vsub.s32 7, %v5542_v54  ;;  %v5127_v18 = vld [vmem:[#allocation7 + $0x148] ss:$16 sps:$4 sm:$0xff]  }
 0x1c4   :  { %v373_v21 = vrot.slane %v5545_v33, %v372_v14  ;;  %v5187_v14 = vld [vmem:[#allocation7 + $0x408] ss:$16 sps:$4 sm:$0xff]  }
 0x1c5   :  { %v1878_v53 = vpop.f32.mrf.mxu0 }
 0x1c6   :  { %v1879_v28 = vadd.f32 %v1878_v53, %v365_v23  ;;  %3732 = vmatpush2.bf16.msra.mxu1 %v5124_v25  ;;  %v5135_v23 = vld [vmem:[#allocation7 + $0x12c] ss:$16 sps:$4 sm:$0xff]   ;;  %v377_v25 = vrot.slane %v5545_v33, %v376_v17 }
 0x1c7   :  { %v1919_v29 = vpop.f32.mrf.mxu1  ;;  %v1880_v34 = vpop.f32.mrf.mxu0  ;;  %3733 = vmatprep.subr.bf16.mxu1 %v5132_v26  ;;  %v5147_v33 = vld [vmem:[#allocation7 + $0x4ec] ss:$16 sps:$4 sm:$0xff]  }
 0x1c8   :  { %v1920_v36 = vadd.f32 %v1919_v29, %v1879_v28  ;;  %v1881_v37 = vadd.f32 %v1880_v34, %v369_v27  ;;  %v5133_v28 = vld [vmem:[#allocation7 + $0x128] ss:$16 sps:$4 sm:$0xff]   ;;  %v5195_v17 = vld [vmem:[#allocation7 + $0x5ec] ss:$16 sps:$4 sm:$0xff]  }
 0x1c9   :  { %v1921_v38 = vpop.f32.mrf.mxu1  ;;  %v1882_v41 = vpop.f32.mrf.mxu0 }
 0x1ca   :  { %v1922_v42 = vadd.f32 %v1921_v38, %v1881_v37  ;;  %3734 = vmatpush2.bf16.msra.mxu1 %v5130_v32  ;;  %v2012_v45 = vmax.f32 %v1920_v36, 0.0  ;;  %v5141_v32 = vld [vmem:[#allocation7 + $0x10c] ss:$16 sps:$4 sm:$0xff]  }
 0x1cb   :  { %v1923_v43 = vpop.f32.mrf.mxu1  ;;  %v1883_v46 = vpop.f32.mrf.mxu0  ;;  %3735 = vmatprep.subr.bf16.mxu1 %v5138_v35 }
 0x1cc   :  { %v2013_v48 = vmax.f32 %v1922_v42, 0.0  ;;  %v5588_v51 = vpack.c.bf16 %v2012_v45, %v2012_v45  ;;  %v5139_v42 = vld [vmem:[#allocation7 + $0x108] ss:$16 sps:$4 sm:$0xff]  }
 0x1cd   :  { %v1924_v49 = vpop.f32.mrf.mxu1 }
 0x1ce   :  { %v5586_v50 = vpack.c.bf16 %v2013_v48, %v2013_v48  ;;  %3736 = vmatpush2.bf16.msra.mxu1 %v5136_v44  ;;  %v5142_v48 = vld [vmem:[#allocation7 + $0x2e8] ss:$16 sps:$4 sm:$0xff]  }
 0x1cf   :  { %3787 = vmatprep.subr.bf16.mxu1 %v5144_v47  ;;  %v5145_v49 = vld [vmem:[#allocation7 + $0x4e8] ss:$16 sps:$4 sm:$0xff]  }
 0x1d0   :  { %3696 = vmatprep.mubr.bf16.mxu0 %v5586_v50 }
 0x1d1   :  { %3697 = vmatmul.mubr.bf16.vlgmr.msra.gmra.mxu0 %v5588_v51 }
 0x1d2   :  { %3747 = vmatpush1.bf16.msra.mxu0 %v5049_v16  ;;  %3778 = vmatprep.mubr.bf16.mxu0 %v5556_v60  ;;  %v5085_v60 = vld [vmem:[#allocation7 + $0x28] ss:$16 sps:$4 sm:$0xff]  }
 0x1d3   :  { %3748 = vmatprep.subr.bf16.mxu0 %v5057_v52  ;;  %v5150_v52 = vld [vmem:[#allocation7 + $0x2cc] ss:$16 sps:$4 sm:$0xff]  }
 0x1d6   :  { %3749 = vmatpush1.bf16.msra.mxu0 %v5055_v19  ;;  %v5153_v19 = vld [vmem:[#allocation7 + $0x4cc] ss:$16 sps:$4 sm:$0xff]  }
 0x1d7   :  { %3750 = vmatprep.subr.bf16.mxu0 %v5063_v55  ;;  %v5148_v55 = vld [vmem:[#allocation7 + $0x2c8] ss:$16 sps:$4 sm:$0xff]  }
 0x1da   :  { %3751 = vmatpush1.bf16.msra.mxu0 %v5061_v56  ;;  %v5151_v56 = vld [vmem:[#allocation7 + $0x4c8] ss:$16 sps:$4 sm:$0xff]  }
 0x1db   :  { %3752 = vmatprep.subr.bf16.mxu0 %v5069_v61  ;;  %v5156_v61 = vld [vmem:[#allocation7 + $0x2ac] ss:$16 sps:$4 sm:$0xff]  }
 0x1de   :  { %3753 = vmatpush1.bf16.msra.mxu0 %v5067_v40  ;;  %v5159_v40 = vld [vmem:[#allocation7 + $0x4ac] ss:$16 sps:$4 sm:$0xff]  }
 0x1df   :  { %3754 = vmatprep.subr.bf16.mxu0 %v5075_v62  ;;  %v5154_v62 = vld [vmem:[#allocation7 + $0x2a8] ss:$16 sps:$4 sm:$0xff]  }
 0x1e2   :  { %3755 = vmatpush1.bf16.msra.mxu0 %v5073_v63  ;;  %v5157_v63 = vld [vmem:[#allocation7 + $0x4a8] ss:$16 sps:$4 sm:$0xff]  }
 0x1e3   :  { %3756 = vmatprep.subr.bf16.mxu0 %v5081_v0  ;;  %v5165_v0 = vld [vmem:[#allocation7 + $0x48c] ss:$16 sps:$4 sm:$0xff]  }
 0x1e6   :  { %3757 = vmatpush1.bf16.msra.mxu0 %v5079_v59  ;;  %v5160_v59 = vld [vmem:[#allocation7 + $0x288] ss:$16 sps:$4 sm:$0xff]  }
 0x1e7   :  { %3758 = vmatprep.subr.bf16.mxu0 %v5087_v1  ;;  %v5163_v1 = vld [vmem:[#allocation7 + $0x488] ss:$16 sps:$4 sm:$0xff]  }
 0x1ea   :  { %3759 = vmatpush1.bf16.msra.mxu0 %v5085_v60  ;;  %v5166_v60 = vld [vmem:[#allocation7 + $0x268] ss:$16 sps:$4 sm:$0xff]  }
 0x1eb   :  { %3760 = vmatprep.subr.bf16.mxu0 %v5093_v2  ;;  %v5169_v2 = vld [vmem:[#allocation7 + $0x468] ss:$16 sps:$4 sm:$0xff]  }
 0x1ee   :  { %3761 = vmatpush1.bf16.msra.mxu0 %v5091_v3  ;;  %v5174_v3 = vld [vmem:[#allocation7 + $0x24c] ss:$16 sps:$4 sm:$0xff]  }
 0x1ef   :  { %3762 = vmatprep.subr.bf16.mxu0 %v5099_v4  ;;  %v5177_v4 = vld [vmem:[#allocation7 + $0x44c] ss:$16 sps:$4 sm:$0xff]  }
 0x1f2   :  { %3763 = vmatpush2.bf16.msra.mxu0 %v5097_v5  ;;  %v5172_v5 = vld [vmem:[#allocation7 + $0x248] ss:$16 sps:$4 sm:$0xff]  }
 0x1f3   :  { %3764 = vmatprep.subr.bf16.mxu0 %v5105_v6  ;;  %v5175_v6 = vld [vmem:[#allocation7 + $0x448] ss:$16 sps:$4 sm:$0xff]  }
 0x1f6   :  { %3765 = vmatpush2.bf16.msra.mxu0 %v5103_v7  ;;  %v5180_v7 = vld [vmem:[#allocation7 + $0x22c] ss:$16 sps:$4 sm:$0xff]  }
 0x1f7   :  { %3766 = vmatprep.subr.bf16.mxu0 %v5111_v8  ;;  %v5183_v8 = vld [vmem:[#allocation7 + $0x42c] ss:$16 sps:$4 sm:$0xff]  }
 0x1fa   :  { %3767 = vmatpush2.bf16.msra.mxu0 %v5109_v9  ;;  %v5178_v9 = vld [vmem:[#allocation7 + $0x228] ss:$16 sps:$4 sm:$0xff]  }
 0x1fb   :  { %3768 = vmatprep.subr.bf16.mxu0 %v5117_v10  ;;  %v5181_v10 = vld [vmem:[#allocation7 + $0x428] ss:$16 sps:$4 sm:$0xff]  }
 0x1fe   :  { %3769 = vmatpush2.bf16.msra.mxu0 %v5115_v11  ;;  %v5186_v11 = vld [vmem:[#allocation7 + $0x20c] ss:$16 sps:$4 sm:$0xff]  }
 0x1ff   :  { %3770 = vmatprep.subr.bf16.mxu0 %v5123_v12  ;;  %v5189_v12 = vld [vmem:[#allocation7 + $0x40c] ss:$16 sps:$4 sm:$0xff]  }
 0x202   :  { %3771 = vmatpush2.bf16.msra.mxu0 %v5121_v13  ;;  %v5184_v13 = vld [vmem:[#allocation7 + $0x208] ss:$16 sps:$4 sm:$0xff]  }
 0x203   :  { %3772 = vmatprep.subr.bf16.mxu0 %v5129_v15  ;;  %v5192_v15 = vld [vmem:[#allocation7 + $0x3ec] ss:$16 sps:$4 sm:$0xff]  }
 0x205   :  { %v1960_v26 = vpop.f32.mrf.mxu0 }
 0x206   :  { %v1961_v27 = vadd.f32 %v1960_v26, %v373_v21  ;;  %3773 = vmatpush2.bf16.msra.mxu0 %v5127_v18  ;;  %v5190_v18 = vld [vmem:[#allocation7 + $0x3e8] ss:$16 sps:$4 sm:$0xff]  }
 0x207   :  { %v2001_v53 = vpop.f32.mrf.mxu1  ;;  %v1962_v29 = vpop.f32.mrf.mxu0  ;;  %3774 = vmatprep.subr.bf16.mxu0 %v5135_v23  ;;  %v5193_v21 = vld [vmem:[#allocation7 + $0x5e8] ss:$16 sps:$4 sm:$0xff]   ;;  %v5198_v23 = vld [vmem:[#allocation7 + $0x3cc] ss:$16 sps:$4 sm:$0xff]  }
 0x208   :  { %v2002_v34 = vadd.f32 %v2001_v53, %v1961_v27  ;;  %v1963_v35 = vadd.f32 %v1962_v29, %v377_v25  ;;  %v5201_v25 = vld [vmem:[#allocation7 + $0x5cc] ss:$16 sps:$4 sm:$0xff]   ;;  %v5196_v26 = vld [vmem:[#allocation7 + $0x3c8] ss:$16 sps:$4 sm:$0xff]  }
 0x209   :  { %v2003_v36 = vpop.f32.mrf.mxu1  ;;  %v1964_v37 = vpop.f32.mrf.mxu0  ;;  %v5199_v27 = vld [vmem:[#allocation7 + $0x5c8] ss:$16 sps:$4 sm:$0xff]   ;;  %v5204_v53 = vld [vmem:[#allocation7 + $0x3ac] ss:$16 sps:$4 sm:$0xff]  }
 0x20a   :  { %v2004_v38 = vadd.f32 %v2003_v36, %v1963_v35  ;;  %3775 = vmatpush2.bf16.msra.mxu0 %v5133_v28  ;;  %v2014_v43 = vmax.f32 %v2002_v34, 0.0  ;;  %v5207_v28 = vld [vmem:[#allocation7 + $0x5ac] ss:$16 sps:$4 sm:$0xff]   ;;  %v5202_v29 = vld [vmem:[#allocation7 + $0x3a8] ss:$16 sps:$4 sm:$0xff]  }
 0x20b   :  { %v2005_v41 = vpop.f32.mrf.mxu1  ;;  %v1965_v44 = vpop.f32.mrf.mxu0  ;;  %3776 = vmatprep.subr.bf16.mxu0 %v5141_v32  ;;  %v5205_v32 = vld [vmem:[#allocation7 + $0x5a8] ss:$16 sps:$4 sm:$0xff]   ;;  %v5210_v34 = vld [vmem:[#allocation7 + $0x38c] ss:$16 sps:$4 sm:$0xff]  }
 0x20c   :  { %v2015_v45 = vmax.f32 %v2004_v38, 0.0  ;;  %v5599_v16 = vpack.c.bf16 %v2014_v43, %v2014_v43  ;;  %v5213_v35 = vld [vmem:[#allocation7 + $0x58c] ss:$16 sps:$4 sm:$0xff]   ;;  %v5208_v36 = vld [vmem:[#allocation7 + $0x388] ss:$16 sps:$4 sm:$0xff]  }
 0x20d   :  { %v2006_v46 = vpop.f32.mrf.mxu1  ;;  %v5211_v37 = vld [vmem:[#allocation7 + $0x588] ss:$16 sps:$4 sm:$0xff]   ;;  %v5216_v38 = vld [vmem:[#allocation7 + $0x36c] ss:$16 sps:$4 sm:$0xff]  }
 0x20e   :  { %v5597_v47 = vpack.c.bf16 %v2015_v45, %v2015_v45  ;;  %3777 = vmatpush2.bf16.msra.mxu0 %v5139_v42  ;;  %v5219_v41 = vld [vmem:[#allocation7 + $0x56c] ss:$16 sps:$4 sm:$0xff]   ;;  %v5214_v42 = vld [vmem:[#allocation7 + $0x368] ss:$16 sps:$4 sm:$0xff]  }
 0x20f   :  { %3828 = vmatprep.subr.bf16.mxu0 %v5147_v33  ;;  %v5217_v43 = vld [vmem:[#allocation7 + $0x568] ss:$16 sps:$4 sm:$0xff]   ;;  %v5222_v44 = vld [vmem:[#allocation7 + $0x34c] ss:$16 sps:$4 sm:$0xff]  }
 0x210   :  { %3737 = vmatprep.mubr.bf16.mxu1 %v5597_v47  ;;  %v5225_v33 = vld [vmem:[#allocation7 + $0x54c] ss:$16 sps:$4 sm:$0xff]   ;;  %v5220_v45 = vld [vmem:[#allocation7 + $0x348] ss:$16 sps:$4 sm:$0xff]  }
 0x211   :  { %3779 = vmatmul.mubr.bf16.vlgmr.msra.gmra.mxu0 %v5570_v58  ;;  %3738 = vmatmul.mubr.bf16.vlgmr.msra.gmra.mxu1 %v5599_v16  ;;  %v5162_v58 = vld [vmem:[#allocation7 + $0x28c] ss:$16 sps:$4 sm:$0xff]   ;;  %v5223_v46 = vld [vmem:[#allocation7 + $0x548] ss:$16 sps:$4 sm:$0xff]  }
 0x212   :  { %3788 = vmatpush1.bf16.msra.mxu1 %v5142_v48  ;;  %3829 = vmatpush1.bf16.msra.mxu0 %v5145_v49  ;;  %v5228_v48 = vld [vmem:[#allocation7 + $0x32c] ss:$16 sps:$4 sm:$0xff]  }
 0x213   :  { %3860 = vmatprep.mubr.bf16.mxu0 %v5586_v50  ;;  %3819 = vmatprep.mubr.bf16.mxu1 %v5576_v20  ;;  %v5168_v50 = vld [vmem:[#allocation7 + $0x26c] ss:$16 sps:$4 sm:$0xff]  }
 0x214   :  { %3789 = vmatprep.subr.bf16.mxu1 %v5150_v52  ;;  %3830 = vmatprep.subr.bf16.mxu0 %v5153_v19  ;;  %v5171_v20 = vld [vmem:[#allocation7 + $0x46c] ss:$16 sps:$4 sm:$0xff]   ;;  %v5226_v19 = vld [vmem:[#allocation7 + $0x328] ss:$16 sps:$4 sm:$0xff]  }
 0x215   :  { %v5231_v49 = vld [vmem:[#allocation7 + $0x52c] ss:$16 sps:$4 sm:$0xff]  }
 0x216   :  { %3790 = vmatpush1.bf16.msra.mxu1 %v5148_v55  ;;  %3831 = vmatpush1.bf16.msra.mxu0 %v5151_v56  ;;  %v5229_v55 = vld [vmem:[#allocation7 + $0x528] ss:$16 sps:$4 sm:$0xff]  }
 0x217   :  { %3791 = vmatprep.subr.bf16.mxu1 %v5156_v61  ;;  %3832 = vmatprep.subr.bf16.mxu0 %v5159_v40  ;;  %v5234_v61 = vld [vmem:[#allocation7 + $0x30c] ss:$16 sps:$4 sm:$0xff]  }
 0x218   :  { %v5237_v40 = vld [vmem:[#allocation7 + $0x50c] ss:$16 sps:$4 sm:$0xff]  }
 0x21a   :  { %3792 = vmatpush1.bf16.msra.mxu1 %v5154_v62  ;;  %3833 = vmatpush1.bf16.msra.mxu0 %v5157_v63  ;;  %v5606_v62 = vld [vmem:[#allocation10 + $0x8] sm:$0xf] }
 0x21b   :  { %3793 = vmatprep.subr.bf16.mxu1 %v5162_v58  ;;  %3834 = vmatprep.subr.bf16.mxu0 %v5165_v0  ;;  %v5232_v58 = vld [vmem:[#allocation7 + $0x308] ss:$16 sps:$4 sm:$0xff]  }
 0x21c   :  { %v5235_v0 = vld [vmem:[#allocation7 + $0x508] ss:$16 sps:$4 sm:$0xff]  }
 0x21e   :  { %3794 = vmatpush1.bf16.msra.mxu1 %v5160_v59  ;;  %3835 = vmatpush1.bf16.msra.mxu0 %v5163_v1  ;;  %v5240_v1 = vld [vmem:[#allocation7 + $0x6ec] ss:$16 sps:$4 sm:$0xff]  }
 0x21f   :  { %3795 = vmatprep.subr.bf16.mxu1 %v5168_v50  ;;  %3836 = vmatprep.subr.bf16.mxu0 %v5171_v20  ;;  %v5286_v50 = vld [vmem:[#allocation8 + $0x78] sm:$0xff]   ;;  %v2285_v20 = vrot.slane %v5606_v62, %v348_v30 }
 0x222   :  { %3796 = vmatpush1.bf16.msra.mxu1 %v5166_v60  ;;  %3837 = vmatpush1.bf16.msra.mxu0 %v5169_v2  ;;  %v2289_v60 = vrot.slane %v5606_v62, %v352_v31  ;;  %v5238_v2 = vld [vmem:[#allocation7 + $0x6e8] ss:$16 sps:$4 sm:$0xff]  }
 0x223   :  { %3797 = vmatprep.subr.bf16.mxu1 %v5174_v3  ;;  %3838 = vmatprep.subr.bf16.mxu0 %v5177_v4  ;;  %v5243_v3 = vld [vmem:[#allocation7 + $0x6cc] ss:$16 sps:$4 sm:$0xff]   ;;  %v5241_v31 = vld [vmem:[#allocation7 + $0x6c8] ss:$16 sps:$4 sm:$0xff]  }
 0x224   :  { %v5287_v4 = vld [vmem:[#allocation8 + $0x38] sm:$0xff]  }
 0x226   :  { %3798 = vmatpush1.bf16.msra.mxu1 %v5172_v5  ;;  %3839 = vmatpush1.bf16.msra.mxu0 %v5175_v6  ;;  %v5288_v6 = vld [vmem:[#allocation8 + $0x70] sm:$0xff]  }
 0x227   :  { %3799 = vmatprep.subr.bf16.mxu1 %v5180_v7  ;;  %3840 = vmatprep.subr.bf16.mxu0 %v5183_v8 }
 0x22a   :  { %3800 = vmatpush1.bf16.msra.mxu1 %v5178_v9  ;;  %3841 = vmatpush1.bf16.msra.mxu0 %v5181_v10  ;;  %v5246_v10 = vld [vmem:[#allocation7 + $0x6ac] ss:$16 sps:$4 sm:$0xff]  }
 0x22b   :  { %3801 = vmatprep.subr.bf16.mxu1 %v5186_v11  ;;  %3842 = vmatprep.subr.bf16.mxu0 %v5189_v12  ;;  %v5289_v11 = vld [vmem:[#allocation8 + $0x30] sm:$0xff]  }
 0x22e   :  { %3802 = vmatpush1.bf16.msra.mxu1 %v5184_v13  ;;  %3843 = vmatpush1.bf16.msra.mxu0 %v5187_v14  ;;  %v5290_v13 = vld [vmem:[#allocation8 + $0x68] sm:$0xff]  }
 0x22f   :  { %3803 = vmatprep.subr.bf16.mxu1 %v5192_v15  ;;  %3844 = vmatprep.subr.bf16.mxu0 %v5195_v17  ;;  %v5249_v15 = vld [vmem:[#allocation7 + $0x68c] ss:$16 sps:$4 sm:$0xff]  }
 0x230   :  { %v5291_v17 = vld [vmem:[#allocation8 + $0x28] sm:$0xff]  }
 0x232   :  { %3804 = vmatpush2.bf16.msra.mxu1 %v5190_v18  ;;  %3845 = vmatpush2.bf16.msra.mxu0 %v5193_v21  ;;  %v5247_v18 = vld [vmem:[#allocation7 + $0x688] ss:$16 sps:$4 sm:$0xff]   ;;  %v5252_v21 = vld [vmem:[#allocation7 + $0x66c] ss:$16 sps:$4 sm:$0xff]  }
 0x233   :  { %3805 = vmatprep.subr.bf16.mxu1 %v5198_v23  ;;  %3846 = vmatprep.subr.bf16.mxu0 %v5201_v25  ;;  %v5293_v23 = vld [vmem:[#allocation8 + $0x20] sm:$0xff]   ;;  %v5294_v25 = vld [vmem:[#allocation8 + $0x58] sm:$0xff]  }
 0x236   :  { %3806 = vmatpush2.bf16.msra.mxu1 %v5196_v26  ;;  %3847 = vmatpush2.bf16.msra.mxu0 %v5199_v27  ;;  %v5250_v26 = vld [vmem:[#allocation7 + $0x668] ss:$16 sps:$4 sm:$0xff]   ;;  %v5255_v27 = vld [vmem:[#allocation7 + $0x64c] ss:$16 sps:$4 sm:$0xff]  }
 0x237   :  { %3807 = vmatprep.subr.bf16.mxu1 %v5204_v53  ;;  %3848 = vmatprep.subr.bf16.mxu0 %v5207_v28  ;;  %v5295_v53 = vld [vmem:[#allocation8 + $0x18] sm:$0xff]   ;;  %v5296_v28 = vld [vmem:[#allocation8 + $0x50] sm:$0xff]  }
 0x23a   :  { %3808 = vmatpush2.bf16.msra.mxu1 %v5202_v29  ;;  %3849 = vmatpush2.bf16.msra.mxu0 %v5205_v32  ;;  %v5253_v29 = vld [vmem:[#allocation7 + $0x648] ss:$16 sps:$4 sm:$0xff]   ;;  %v5258_v32 = vld [vmem:[#allocation7 + $0x62c] ss:$16 sps:$4 sm:$0xff]  }
 0x23b   :  { %3809 = vmatprep.subr.bf16.mxu1 %v5210_v34  ;;  %3850 = vmatprep.subr.bf16.mxu0 %v5213_v35  ;;  %v5297_v34 = vld [vmem:[#allocation8 + $0x10] sm:$0xff]   ;;  %v5298_v35 = vld [vmem:[#allocation8 + $0x48] sm:$0xff]  }
 0x23e   :  { %3810 = vmatpush2.bf16.msra.mxu1 %v5208_v36  ;;  %3851 = vmatpush2.bf16.msra.mxu0 %v5211_v37  ;;  %v5256_v36 = vld [vmem:[#allocation7 + $0x628] ss:$16 sps:$4 sm:$0xff]   ;;  %v5261_v37 = vld [vmem:[#allocation7 + $0x60c] ss:$16 sps:$4 sm:$0xff]  }
 0x23f   :  { %3811 = vmatprep.subr.bf16.mxu1 %v5216_v38  ;;  %3852 = vmatprep.subr.bf16.mxu0 %v5219_v41  ;;  %v5299_v38 = vld [vmem:[#allocation8 + $0x8] sm:$0xff]   ;;  %v5300_v41 = vld [vmem:[#allocation8 + $0x40] sm:$0xff]  }
 0x242   :  { %3812 = vmatpush2.bf16.msra.mxu1 %v5214_v42  ;;  %3853 = vmatpush2.bf16.msra.mxu0 %v5217_v43  ;;  %v5259_v42 = vld [vmem:[#allocation7 + $0x608] ss:$16 sps:$4 sm:$0xff]   ;;  %v5264_v43 = vld [vmem:[#allocation7 + $0x7ec] ss:$16 sps:$4 sm:$0xff]  }
 0x243   :  { %3813 = vmatprep.subr.bf16.mxu1 %v5222_v44  ;;  %3854 = vmatprep.subr.bf16.mxu0 %v5225_v33  ;;  %v5301_v44 = vld [vmem:[#allocation8] sm:$0xff]   ;;  %v5262_v33 = vld [vmem:[#allocation7 + $0x7e8] ss:$16 sps:$4 sm:$0xff]  }
 0x245   :  { %v3616_v52 = vpop.f32.mrf.mxu0 }
 0x246   :  { %3814 = vmatpush2.bf16.msra.mxu1 %v5220_v45  ;;  %3855 = vmatpush2.bf16.msra.mxu0 %v5223_v46  ;;  %v3617_v5 = vadd.f32 %v3616_v52, %v2285_v20  ;;  %v5267_v45 = vld [vmem:[#allocation7 + $0x7cc] ss:$16 sps:$4 sm:$0xff]   ;;  %v5265_v46 = vld [vmem:[#allocation7 + $0x7c8] ss:$16 sps:$4 sm:$0xff]  }
 0x247   :  { %v3618_v56 = vpop.f32.mrf.mxu0  ;;  %3815 = vmatprep.subr.bf16.mxu1 %v5228_v48  ;;  %3856 = vmatprep.subr.bf16.mxu0 %v5231_v49  ;;  %v5270_v48 = vld [vmem:[#allocation7 + $0x7ac] ss:$16 sps:$4 sm:$0xff]   ;;  %v5268_v49 = vld [vmem:[#allocation7 + $0x7a8] ss:$16 sps:$4 sm:$0xff]  }
 0x248   :  { %v3619_v8 = vadd.f32 %v3618_v56, %v2289_v60  ;;  %v5273_v52 = vld [vmem:[#allocation7 + $0x78c] ss:$16 sps:$4 sm:$0xff]   ;;  %v5274_v56 = vld [vmem:[#allocation7 + $0x768] ss:$16 sps:$4 sm:$0xff]  }
 0x249   :  { %v3620_v63 = vpop.f32.mrf.mxu0 }
 0x24a   :  { %3816 = vmatpush2.bf16.msra.mxu1 %v5226_v19  ;;  %3857 = vmatpush2.bf16.msra.mxu0 %v5229_v55  ;;  %v5271_v19 = vld [vmem:[#allocation7 + $0x788] ss:$16 sps:$4 sm:$0xff]   ;;  %v5276_v55 = vld [vmem:[#allocation7 + $0x76c] ss:$16 sps:$4 sm:$0xff]  }
 0x24b   :  { %v3621_v59 = vpop.f32.mrf.mxu0  ;;  %3817 = vmatprep.subr.bf16.mxu1 %v5234_v61  ;;  %3858 = vmatprep.subr.bf16.mxu0 %v5237_v40  ;;  %v5279_v61 = vld [vmem:[#allocation7 + $0x74c] ss:$16 sps:$4 sm:$0xff]   ;;  %v5277_v40 = vld [vmem:[#allocation7 + $0x748] ss:$16 sps:$4 sm:$0xff]  }
 0x24c   :  { %v5282_v63 = vld [vmem:[#allocation7 + $0x72c] ss:$16 sps:$4 sm:$0xff]   ;;  %v5283_v59 = vld [vmem:[#allocation7 + $0x708] ss:$16 sps:$4 sm:$0xff]  }
 0x24e   :  { %3818 = vmatpush2.bf16.msra.mxu1 %v5232_v58  ;;  %3859 = vmatpush2.bf16.msra.mxu0 %v5235_v0  ;;  %v5280_v58 = vld [vmem:[#allocation7 + $0x728] ss:$16 sps:$4 sm:$0xff]   ;;  %v5285_v0 = vld [vmem:[#allocation7 + $0x70c] ss:$16 sps:$4 sm:$0xff]  }
 0x24f   :  { %3869 = vmatprep.subr.bf16.mxu1 %v5240_v1  ;;  %4842 = vmatprep.subr.bf16.mxu0 %v5286_v50 }
 0x251   :  { %3820 = vmatmul.mubr.bf16.vlgmr.msra.gmra.mxu1 %v5578_v24  ;;  %3861 = vmatmul.mubr.bf16.vlgmr.msra.gmra.mxu0 %v5588_v51  ;;  %v3657_v7 = vpop.f32.mrf.mxu1  ;;  %v5244_v51 = vld [vmem:[#allocation7 + $0x6a8] ss:$16 sps:$4 sm:$0xff]  }
 0x252   :  { %v5616_v30 = vadd.f32 %v3657_v7, %v3617_v5  ;;  %3870 = vmatpush1.bf16.msra.mxu1 %v5238_v2  ;;  %3901 = vmatprep.mubr.bf16.mxu1 %v5597_v47  ;;  %v5292_v47 = vld [vmem:[#allocation8 + $0x60] sm:$0xff]   ;;  %v5304_v5 = vld [vmem:[#allocation8 + $0xf0] sm:$0xff]   ;;  %v5306_v7 = vld [vmem:[#allocation8 + $0xe8] sm:$0xff]  }
 0x253   :  { %v3659_v9 = vpop.f32.mrf.mxu1  ;;  %3871 = vmatprep.subr.bf16.mxu1 %v5243_v3  ;;  %4843 = vmatpush3.bf16.msra.mxu0 %v5287_v4  ;;  %v5302_v3 = vld [vmem:[#allocation8 + $0xf8] sm:$0xff]  }
 0x254   :  { %v5619_v12 = vadd.f32 %v3659_v9, %v3619_v8  ;;  %4844 = vmatprep.subr.bf16.mxu0 %v5288_v6  ;;  %v5303_v4 = vld [vmem:[#allocation8 + $0xb8] sm:$0xff]   ;;  %v5305_v6 = vld [vmem:[#allocation8 + $0xb0] sm:$0xff]   ;;  %v5307_v8 = vld [vmem:[#allocation8 + $0xa8] sm:$0xff]  }
 0x255   :  { %v3661_v24 = vpop.f32.mrf.mxu1  ;;  %v5310_v9 = vld [vmem:[#allocation8 + $0xd8] sm:$0xff]  }
 0x256   :  { %3872 = vmatpush1.bf16.msra.mxu1 %v5241_v31  ;;  %v5308_v31 = vld [vmem:[#allocation8 + $0xe0] sm:$0xff]  }
 0x257   :  { %v3662_v14 = vpop.f32.mrf.mxu1  ;;  %3873 = vmatprep.subr.bf16.mxu1 %v5246_v10  ;;  %4845 = vmatpush3.bf16.msra.mxu0 %v5289_v11  ;;  %v5312_v10 = vld [vmem:[#allocation8 + $0xd0] sm:$0xff]  }
 0x258   :  { %4846 = vmatprep.subr.bf16.mxu0 %v5290_v13  ;;  %v5313_v11 = vld [vmem:[#allocation8 + $0x90] sm:$0xff]  }
 0x25a   :  { %3874 = vmatpush1.bf16.msra.mxu1 %v5244_v51 }
 0x25b   :  { %3875 = vmatprep.subr.bf16.mxu1 %v5249_v15  ;;  %4847 = vmatpush3.bf16.msra.mxu0 %v5291_v17  ;;  %v5314_v15 = vld [vmem:[#allocation8 + $0xc8] sm:$0xff]  }
 0x25c   :  { %4848 = vmatprep.subr.bf16.mxu0 %v5292_v47 }
 0x25e   :  { %3876 = vmatpush1.bf16.msra.mxu1 %v5247_v18  ;;  %v5315_v18 = vld [vmem:[#allocation8 + $0x88] sm:$0xff]  }
 0x25f   :  { %3877 = vmatprep.subr.bf16.mxu1 %v5252_v21  ;;  %4849 = vmatpush3.bf16.msra.mxu0 %v5293_v23 }
 0x260   :  { %4850 = vmatprep.subr.bf16.mxu0 %v5294_v25 }
 0x262   :  { %3878 = vmatpush1.bf16.msra.mxu1 %v5250_v26 }
 0x263   :  { %3879 = vmatprep.subr.bf16.mxu1 %v5255_v27  ;;  %4851 = vmatpush3.bf16.msra.mxu0 %v5295_v53  ;;  %v5316_v53 = vld [vmem:[#allocation8 + $0xc0] sm:$0xff]  }
 0x264   :  { %4852 = vmatprep.subr.bf16.mxu0 %v5296_v28 }
 0x266   :  { %3880 = vmatpush1.bf16.msra.mxu1 %v5253_v29 }
 0x267   :  { %3881 = vmatprep.subr.bf16.mxu1 %v5258_v32  ;;  %4853 = vmatpush3.bf16.msra.mxu0 %v5297_v34  ;;  %v5317_v32 = vld [vmem:[#allocation8 + $0x80] sm:$0xff]  }
 0x268   :  { %4854 = vmatprep.subr.bf16.mxu0 %v5298_v35 }
 0x26a   :  { %3882 = vmatpush1.bf16.msra.mxu1 %v5256_v36 }
 0x26b   :  { %3883 = vmatprep.subr.bf16.mxu1 %v5261_v37  ;;  %4855 = vmatpush3.bf16.msra.mxu0 %v5299_v38 }
 0x26c   :  { %4856 = vmatprep.subr.bf16.mxu0 %v5300_v41 }
 0x26e   :  { %3884 = vmatpush1.bf16.msra.mxu1 %v5259_v42 }
 0x26f   :  { %3885 = vmatprep.subr.bf16.mxu1 %v5264_v43  ;;  %4857 = vmatpush3.bf16.msra.mxu0 %v5301_v44 }
 0x272   :  { %3886 = vmatpush2.bf16.msra.mxu1 %v5262_v33 }
 0x273   :  { %3887 = vmatprep.subr.bf16.mxu1 %v5267_v45 }
 0x276   :  { %3888 = vmatpush2.bf16.msra.mxu1 %v5265_v46 }
 0x277   :  { %3889 = vmatprep.subr.bf16.mxu1 %v5270_v48 }
 0x27a   :  { %3890 = vmatpush2.bf16.msra.mxu1 %v5268_v49  ;;  %v2297_v49 = vrot.slane %v5606_v62, %v360_v57 }
 0x27b   :  { %3891 = vmatprep.subr.bf16.mxu1 %v5273_v52 }
 0x27e   :  { %3892 = vmatpush2.bf16.msra.mxu1 %v5271_v19 }
 0x27f   :  { %3893 = vmatprep.subr.bf16.mxu1 %v5276_v55 }
 0x282   :  { %3894 = vmatpush2.bf16.msra.mxu1 %v5274_v56 }
 0x283   :  { %3895 = vmatprep.subr.bf16.mxu1 %v5279_v61 }
 0x286   :  { %3896 = vmatpush2.bf16.msra.mxu1 %v5277_v40 }
 0x287   :  { %3897 = vmatprep.subr.bf16.mxu1 %v5282_v63 }
 0x28a   :  { %3898 = vmatpush2.bf16.msra.mxu1 %v5280_v58 }
 0x28b   :  { %3899 = vmatprep.subr.bf16.mxu1 %v5285_v0 }
 0x28e   :  { %3900 = vmatpush2.bf16.msra.mxu1 %v5283_v59 }
 0x28f   :  { %4864 = vmatprep.subr.bf16.mxu1 %v5302_v3 }
 0x291   :  { %3902 = vmatmul.mubr.bf16.vlgmr.msra.gmra.mxu1 %v5599_v16  ;;  %v3698_v1 = vpop.f32.mrf.mxu0  ;;  %v5309_v16 = vld [vmem:[#allocation8 + $0xa0] sm:$0xff]  }
 0x292   :  { %v3699_v50 = vadd.f32 %v3698_v1, %v5616_v30  ;;  %4865 = vmatpush3.bf16.msra.mxu1 %v5303_v4  ;;  %v5311_v30 = vld [vmem:[#allocation8 + $0x98] sm:$0xff]  }
 0x293   :  { %v3700_v20 = vpop.f32.mrf.mxu0  ;;  %4866 = vmatprep.subr.bf16.mxu1 %v5304_v5  ;;  %v4263_v5 = vand.u32 127, %v346_v22 }
 0x294   :  { %v3701_v51 = vadd.f32 %v3700_v20, %v5619_v12  ;;  %v2293_v12 = vrot.slane %v5606_v62, %v356_v39  ;;  %v4809_v62 = vld [vmem:[#allocation10 + $0xc] ss:$0 sm:$0xff] }
 0x295   :  { %v3702_v60 = vpop.f32.mrf.mxu0  ;;  %vm4264_vm0 = vcmp.lt.s32.totalorder %v4263_v5, 10 }
 0x296   :  { %4867 = vmatpush3.bf16.msra.mxu1 %v5305_v6 }
 0x297   :  { %v3703_v2 = vpop.f32.mrf.mxu0  ;;  %4868 = vmatprep.subr.bf16.mxu1 %v5306_v7 }
 0x29a   :  { %4869 = vmatpush3.bf16.msra.mxu1 %v5307_v8 }
 0x29b   :  { %4870 = vmatprep.subr.bf16.mxu1 %v5308_v31 }
 0x29e   :  { %4871 = vmatpush3.bf16.msra.mxu1 %v5309_v16 }
 0x29f   :  { %4872 = vmatprep.subr.bf16.mxu1 %v5310_v9 }
 0x2a2   :  { %4873 = vmatpush3.bf16.msra.mxu1 %v5311_v30 }
 0x2a3   :  { %4874 = vmatprep.subr.bf16.mxu1 %v5312_v10 }
 0x2a6   :  { %4875 = vmatpush3.bf16.msra.mxu1 %v5313_v11 }
 0x2a7   :  { %4876 = vmatprep.subr.bf16.mxu1 %v5314_v15 }
 0x2aa   :  { %4877 = vmatpush3.bf16.msra.mxu1 %v5315_v18 }
 0x2ab   :  { %4878 = vmatprep.subr.bf16.mxu1 %v5316_v53 }
 0x2ae   :  { %4879 = vmatpush3.bf16.msra.mxu1 %v5317_v32 }
 0x2d1   :  { %v3780_v13 = vpop.f32.mrf.mxu0  ;;  %v3739_v24 = vpop.f32.mrf.mxu1 }
 0x2d2   :  { %v3740_v14 = vadd.f32 %v3739_v24, %v3699_v50  ;;  %v3781_v36 = vadd.f32 %v3780_v13, %v2293_v12 }
 0x2d3   :  { %v3782_v17 = vpop.f32.mrf.mxu0  ;;  %v3741_v47 = vpop.f32.mrf.mxu1 }
 0x2d4   :  { %v3742_v21 = vadd.f32 %v3741_v47, %v3701_v51  ;;  %v3910_v23 = vmax.f32 %v3740_v14, 0.0  ;;  %v3783_v52 = vadd.f32 %v3782_v17, %v2297_v49 }
 0x2d5   :  { %v3784_v25 = vpop.f32.mrf.mxu0  ;;  %v3743_v26 = vpop.f32.mrf.mxu1 }
 0x2d6   :  { %v3911_v27 = vmax.f32 %v3742_v21, 0.0  ;;  %v3914_v35 = vpack.c.bf16 %v3910_v23, %v3910_v23 }
 0x2d7   :  { %v3785_v28 = vpop.f32.mrf.mxu0  ;;  %v3744_v29 = vpop.f32.mrf.mxu1 }
 0x2d8   :  { %v3915_v34 = vpack.c.bf16 %v3911_v27, %v3911_v27 }
 0x2da   :  { %4213 = vmatprep.mubr.bf16.mxu0 %v3915_v34 }
 0x2db   :  { %4214 = vmatmul.mubr.bf16.vlgmr.msra.gmra.mxu0 %v3914_v35 }
 0x311   :  { %v3821_v37 = vpop.f32.mrf.mxu1  ;;  %v3862_v38 = vpop.f32.mrf.mxu0 }
 0x312   :  { %v3822_v41 = vadd.f32 %v3821_v37, %v3781_v36 }
 0x313   :  { %v3823_v42 = vpop.f32.mrf.mxu1  ;;  %v3864_v43 = vpop.f32.mrf.mxu0 }
 0x314   :  { %v3863_v44 = vadd.f32 %v3862_v38, %v3822_v41  ;;  %v3824_v19 = vadd.f32 %v3823_v42, %v3783_v52 }
 0x315   :  { %v3825_v33 = vpop.f32.mrf.mxu1  ;;  %v3866_v45 = vpop.f32.mrf.mxu0 }
 0x316   :  { %v3865_v56 = vadd.f32 %v3864_v43, %v3824_v19 }
 0x317   :  { %v3826_v46 = vpop.f32.mrf.mxu1  ;;  %v3867_v48 = vpop.f32.mrf.mxu0 }
 0x351   :  { %v3903_v55 = vpop.f32.mrf.mxu1 }
 0x352   :  { %v3904_v39 = vadd.f32 %v3903_v55, %v3863_v44 }
 0x353   :  { %v3905_v61 = vpop.f32.mrf.mxu1 }
 0x354   :  { %v3906_v40 = vadd.f32 %v3905_v61, %v3865_v56  ;;  %v3912_v63 = vmax.f32 %v3904_v39, 0.0 }
 0x355   :  { %v3907_v58 = vpop.f32.mrf.mxu1 }
 0x356   :  { %v3913_v0 = vmax.f32 %v3906_v40, 0.0  ;;  %v3916_v50 = vpack.c.bf16 %v3912_v63, %v3912_v63 }
 0x357   :  { %v3908_v59 = vpop.f32.mrf.mxu1 }
 0x358   :  { %v3917_v1 = vpack.c.bf16 %v3913_v0, %v3913_v0 }
 0x35a   :  { %4253 = vmatprep.mubr.bf16.mxu1 %v3917_v1 }
 0x35b   :  { %4254 = vmatmul.mubr.bf16.vlgmr.msra.gmra.mxu1 %v3916_v50 }
 0x39b   :  { %v4858_v20 = vpop.f32.mrf.mxu0 }
 0x39d   :  { %v4859_v60 = vpop.f32.mrf.mxu0 }
 0x39e   :  { %v4860_v54 = vadd.f32 %v4859_v60, %v4858_v20 }
 0x39f   :  { %v4861_v2 = vpop.f32.mrf.mxu0 }
 0x3a0   :  { %v4216_v6 = vadd.f32 %v4860_v54, %v4809_v62 }
 0x3a1   :  { %v4862_v57 = vpop.f32.mrf.mxu0 }
 0x41b   :  { %v4880_v3 = vpop.f32.mrf.mxu1 }
 0x41d   :  { %v4881_v4 = vpop.f32.mrf.mxu1 }
 0x41e   :  { %v4882_v7 = vadd.f32 %v4881_v4, %v4880_v3 }
 0x41f   :  { %v4883_v8 = vpop.f32.mrf.mxu1 }
 0x420   :  { %v4256_v31 = vadd.f32 %v4882_v7, %v4216_v6 }
 0x421   :  { %v4884_v16 = vpop.f32.mrf.mxu1 }
 0x422   :  { %v4261_v9 = vmax.f32 %v4256_v31, 0.0 }
 0x424   :  { %v4265_v30 = vsel %vm4264_vm0, %v4261_v9, -1e+30 }
 0x425   :  { %4266 = vmax.xlane.f32.xlu0 %v4265_v30 }
 0x4ae   :  { %v4267_v10 = vpop.xlane.xlu0 %4266 }
 0x4af   :  { %v4268_v11 = vsub.f32 %v4265_v30, %v4267_v10 }
 0x4b1   :  { %v4269_v13 = vmul.f32 1.442695, %v4268_v11 }
 0x4b3   :  { %5318 = vpow2.f32 %v4269_v13 }
 0x4c0   :  { %v5319_v24 = vpop.eup %5318 }
 0x4c1   :  { %4271 = vadd.xlane.f32.xlu0 %v5319_v24 }
 0x54a   :  { %v4272_v51 = vpop.xlane.xlu0 %4271 }
 0x54b   :  { %5320 = vrcp.f32 %v4272_v51 }
 0x558   :  { %v5321_v22 = vpop.eup %5320 }
 0x559   :  { %v4274_v14 = vmul.f32 %v5321_v22, %v5319_v24 }
 0x55b   :  { %4275 = vst [vmem:[#allocation11] sm:$0xff] %v4274_v14 }
 0x55c   :  { %5433 = shalt.err (!%p5430_p1)
}
 0x55d   :  { %4285 = dma.vmem_to_hbm [thread:$0]  %s4283_s4, 128, %s5639_s5, [#allocation4]  }
 0x55e   :  { %5448 = dma.done.wait [#allocation4], 128  }
 0x55f   :  { %5449 = vsyncadd [#allocation4], 4294967168 }
 0x560   :  { %4289 = vsyncpa [#allocation3], 1 }
 0x561   :  { %4290 = vsyncpa [#allocation6], 1 }
 0x562   :  { %4291 = vsyncpa [#allocation9], 1 }
 0x563   :  { %4292 = vsyncpa [#allocation4], 1 }

</bundles_post_ra>
